<compile_context>
chip_gen: v6e
topology: v6e:2x2x1
jax: 0.10.0
libtpu: 0.0.40
codegen_flags: <defaults>
</compile_context>

<pallas_src>
import functools

import jax
import jax.numpy as jnp
from jax import lax
from jax.experimental import pallas as pl
from jax.experimental.pallas import tpu as pltpu

BN_EPS = 1e-5
LANE = 128


def _round_up(x, m):
    return (x + m - 1) // m * m


# ----------------------------- Pallas kernel --------------------------------
def _conv_bn_kernel(x_ref, w_ref, b_ref, *rest, k, stride, Ho, Wo, Hq,
                    relu, has_residual):
    """Fused (in-kernel im2col) conv + folded-BN + (residual) + (ReLU).

    x_ref : (1, s*s*Hq, Wq, Cin) bf16 — stride-phase decomposed, padded input
    w_ref : (k*k, Cin, Coutp)    bf16 — BN scale already folded in
    b_ref : (1, Coutp)           f32  — folded BN bias
    rest  : [r_ref (1, M, Coutp) f32,]  o_ref (1, M, Coutp)
    """
    if has_residual:
        r_ref, o_ref = rest
    else:
        (o_ref,) = rest
    s = stride
    cin = x_ref.shape[-1]
    coutp = o_ref.shape[-1]

    x = x_ref[0]                                    # (s*s*Hq, Wq, Cin) bf16
    acc = jnp.zeros((Ho * Wo, coutp), jnp.float32)
    t = 0
    for dh in range(k):                             # static unrolled taps
        for dw in range(k):
            ph = (dh % s) * s + (dw % s)            # stride phase of this tap
            r0 = ph * Hq + dh // s                  # static offsets
            c0 = dw // s
            xs = x[r0:r0 + Ho, c0:c0 + Wo, :].reshape(Ho * Wo, cin)
            acc = acc + jnp.dot(xs, w_ref[t],
                                preferred_element_type=jnp.float32)
            t += 1
    acc = acc + b_ref[...]                          # folded BN bias (f32)
    if has_residual:
        acc = acc + r_ref[0]                        # shortcut (f32)
    if relu:
        acc = jnp.maximum(acc, 0.0)
    o_ref[0] = acc.astype(o_ref.dtype)


def fused_conv_bn(x_nhwc, w_oihw, bn, *, stride, pad, residual=None,
                  relu, out_dtype=jnp.float32):
    """Conv(k,k,stride,pad,no-bias) + eval-BN (+residual) (+ReLU).

    x_nhwc: (N,H,W,Cin); w_oihw: torch layout (Cout,Cin,k,k).
    Returns (N, Ho*Wo, Coutp) with Coutp = Cout rounded up to 128 (lane-dense);
    padded channels are exactly zero.
    """
    N, H, W, Cin = x_nhwc.shape
    Cout, _, k, _ = w_oihw.shape
    s = stride
    Ho = (H + 2 * pad - k) // s + 1
    Wo = (W + 2 * pad - k) // s + 1
    M = Ho * Wo
    Coutp = _round_up(Cout, LANE)

    # ---- fold eval-mode BN into the weight (scale) and a bias vector; pad Cout.
    scale = bn["gamma"] / jnp.sqrt(bn["var"] + BN_EPS)
    bias = bn["beta"] - bn["mean"] * scale
    w = jnp.transpose(w_oihw, (2, 3, 1, 0)) * scale              # (k,k,Cin,Cout)
    w = jnp.pad(w, ((0, 0), (0, 0), (0, 0), (0, Coutp - Cout)))
    w = w.reshape(k * k, Cin, Coutp).astype(jnp.bfloat16)        # bf16 MXU input
    b = jnp.pad(bias, (0, Coutp - Cout)).reshape(1, Coutp).astype(jnp.float32)

    # ---- spatially pad + stride-phase decompose the activation (~1x bytes);
    #      every conv tap then becomes a static contiguous slice in-kernel.
    Hq = Ho + (k - 1) // s
    Wq = Wo + (k - 1) // s
    xp = jnp.pad(x_nhwc, ((0, 0), (pad, pad), (pad, pad), (0, 0)))
    phases = []
    for a in range(s):
        for bb in range(s):
            p = xp[:, a::s, bb::s, :][:, :Hq, :Wq, :]
            p = jnp.pad(p, ((0, 0), (0, Hq - p.shape[1]),
                            (0, Wq - p.shape[2]), (0, 0)))
            phases.append(p)
    xph = phases[0] if len(phases) == 1 else jnp.concatenate(phases, axis=1)
    xph = xph.astype(jnp.bfloat16)                 # (N, s*s*Hq, Wq, Cin) bf16

    in_specs = [
        pl.BlockSpec((1, s * s * Hq, Wq, Cin), lambda n: (n, 0, 0, 0)),
        pl.BlockSpec((k * k, Cin, Coutp), lambda n: (0, 0, 0)),   # resident
        pl.BlockSpec((1, Coutp), lambda n: (0, 0)),               # resident
    ]
    args = [xph, w, b]
    if residual is not None:                       # optional — no zeros DMA
        residual = residual.astype(jnp.float32)
        in_specs.append(pl.BlockSpec((1, M, Coutp), lambda n: (n, 0, 0)))
        args.append(residual)

    flops = 2 * N * M * (k * k * Cin) * Coutp
    bytes_accessed = (xph.size * 2 + w.size * 2 + b.size * 4
                      + (residual.size * 4 if residual is not None else 0)
                      + N * M * Coutp * jnp.dtype(out_dtype).itemsize)

    kern = functools.partial(_conv_bn_kernel, k=k, stride=s, Ho=Ho, Wo=Wo,
                             Hq=Hq, relu=relu,
                             has_residual=residual is not None)
    return pl.pallas_call(
        kern,
        out_shape=jax.ShapeDtypeStruct((N, M, Coutp), out_dtype),
        grid=(N,),                                 # one image per step, parallel
        in_specs=in_specs,
        out_specs=pl.BlockSpec((1, M, Coutp), lambda n: (n, 0, 0)),
        compiler_params=pltpu.CompilerParams(
            dimension_semantics=("parallel",),
            vmem_limit_bytes=32 * 1024 * 1024),
        cost_estimate=pl.CostEstimate(flops=flops, transcendentals=0,
                                      bytes_accessed=bytes_accessed),
    )(*args)


# ------------------------------- forward -------------------------------------
def basic_block_forward(params, x_nchw, stride):
    x = jnp.transpose(x_nchw, (0, 2, 3, 1)).astype(jnp.float32)   # NHWC
    N, H, W, Cin = x.shape
    planes = params["w1"].shape[0]
    Coutp = _round_up(planes, LANE)
    Ho = (H + 2 - 3) // stride + 1
    Wo = (W + 2 - 3) // stride + 1

    # conv1 -> bn1 -> relu   (no residual; bf16 output feeds conv2's MXU)
    out1 = fused_conv_bn(x, params["w1"], params["bn1"], stride=stride, pad=1,
                         relu=True, out_dtype=jnp.bfloat16)
    out1 = out1[:, :, :planes].reshape(N, Ho, Wo, planes)

    # shortcut (f32, Cout already padded -> used directly as residual)
    if stride != 1 or Cin != planes:
        # 1x1/stride-s conv == subsample (cheap JAX strided slice) + 1x1 matmul
        x_sub = x[:, ::stride, ::stride, :]
        shortcut = fused_conv_bn(x_sub, params["ws"], params["bns"], stride=1,
                                 pad=0, relu=False, out_dtype=jnp.float32)
    else:
        # identity: Ho==H, Wo==W in this branch, so row ordering matches conv2.
        shortcut = jnp.pad(x, ((0, 0), (0, 0), (0, 0), (0, Coutp - planes)))
        shortcut = shortcut.reshape(N, Ho * Wo, Coutp)

    # conv2 -> bn2 -> (+shortcut) -> relu, fused in one kernel call
    out2 = fused_conv_bn(out1, params["w2"], params["bn2"], stride=1, pad=1,
                         residual=shortcut, relu=True, out_dtype=jnp.float32)
    out2 = out2[:, :, :planes].reshape(N, Ho, Wo, planes)
    return jnp.transpose(out2, (0, 3, 1, 2))                      # back to NCHW


# --------------------------- pure-JAX reference -------------------------------
# Mirrors the kernel path's bf16 MXU-input casts (f32 accumulate) so the
# comparison is tight; module semantics (conv/BN/residual/ReLU) are identical.
def basic_block_reference(params, x_nchw, stride):
    x = jnp.transpose(x_nchw, (0, 2, 3, 1)).astype(jnp.float32)

    def conv_bn(xin, w, bn, s, p):
        scale = bn["gamma"] / jnp.sqrt(bn["var"] + BN_EPS)
        bias = bn["beta"] - bn["mean"] * scale
        w_hwio = (jnp.transpose(w, (2, 3, 1, 0)) * scale).astype(jnp.bfloat16)
        y = lax.conv_general_dilated(
            xin.astype(jnp.bfloat16), w_hwio, (s, s), [(p, p), (p, p)],
            dimension_numbers=("NHWC", "HWIO", "NHWC"),
            preferred_element_type=jnp.float32)
        return y + bias

    planes = params["w1"].shape[0]
    Cin = x.shape[-1]
    out = jax.nn.relu(conv_bn(x, params["w1"], params["bn1"], stride, 1))
    out = conv_bn(out, params["w2"], params["bn2"], 1, 1)
    if stride != 1 or Cin != planes:
        sc = conv_bn(x, params["ws"], params["bns"], stride, 0)
    else:
        sc = x
    out = jax.nn.relu(out + sc)
    return jnp.transpose(out, (0, 3, 1, 2))


# ------------------------------ param init ------------------------------------
def _bn_init(key, c):
    k1, k2, k3, k4 = jax.random.split(key, 4)
    return {
        "gamma": 1.0 + 0.1 * jax.random.normal(k1, (c,), jnp.float32),
        "beta": 0.1 * jax.random.normal(k2, (c,), jnp.float32),
        "mean": 0.1 * jax.random.normal(k3, (c,), jnp.float32),
        "var": 0.5 + jnp.abs(jax.random.normal(k4, (c,), jnp.float32)),
    }


def init_params(key, in_planes, planes, stride):
    ks = jax.random.split(key, 6)
    p = {
        "w1": 0.2 * jax.random.normal(ks[0], (planes, in_planes, 3, 3), jnp.float32),
        "bn1": _bn_init(ks[1], planes),
        "w2": 0.2 * jax.random.normal(ks[2], (planes, planes, 3, 3), jnp.float32),
        "bn2": _bn_init(ks[3], planes),
    }
    if stride != 1 or in_planes != planes:
        p["ws"] = 0.2 * jax.random.normal(ks[4], (planes, in_planes, 1, 1), jnp.float32)
        p["bns"] = _bn_init(ks[5], planes)
    return p


# --------------------------------- main ---------------------------------------
if __name__ == "__main__":
    # Config 1: downsample block (conv shortcut), matches the torch example.
    in_planes, planes, stride = 4, 8, 2
    key = jax.random.PRNGKey(0)
    kx, kp = jax.random.split(key)
    x = jax.random.normal(kx, (2, in_planes, 16, 16), jnp.float32)   # NCHW
    params = init_params(kp, in_planes, planes, stride)

    fwd = jax.jit(functools.partial(basic_block_forward, stride=stride))
    out = jax.block_until_ready(fwd(params, x))
    ref = jax.block_until_ready(basic_block_reference(params, x, stride))
    assert out.shape == ref.shape == (2, planes, 16 // stride, 16 // stride)
    err = float(jnp.max(jnp.abs(out - ref)))
    assert jnp.allclose(out, ref, atol=2e-2, rtol=2e-2), f"mismatch, max err {err}"

    # Config 2: identity-shortcut branch (stride=1, Cin == planes).
    key2 = jax.random.PRNGKey(0)
    kx2, kp2 = jax.random.split(jax.random.fold_in(key2, 1))
    x2 = jax.random.normal(kx2, (2, planes, 16, 16), jnp.float32)
    params2 = init_params(kp2, planes, planes, 1)
    fwd2 = jax.jit(functools.partial(basic_block_forward, stride=1))
    out2 = jax.block_until_ready(fwd2(params2, x2))
    ref2 = jax.block_until_ready(basic_block_reference(params2, x2, 1))
    err2 = float(jnp.max(jnp.abs(out2 - ref2)))
    assert jnp.allclose(out2, ref2, atol=2e-2, rtol=2e-2), f"mismatch, max err {err2}"

    print("KERNEL_OK")
</pallas_src>

<mosaic_0001>
module attributes {stable_mosaic.version = 11 : i64} {
  func.func @_conv_bn_kernel(%arg0: i32, %arg1: memref<1x8x8x4xbf16, #tpu.memory_space<vmem>>, %arg2: memref<1x4x128xbf16, #tpu.memory_space<vmem>>, %arg3: memref<1x128xf32, #tpu.memory_space<vmem>>, %arg4: memref<1x64x128xf32, #tpu.memory_space<vmem>>) attributes {dimension_semantics = [#tpu.dimension_semantics<parallel>], iteration_bounds = array<i64: 2>, scalar_prefetch = 0 : i64, scratch_operands = 0 : i64, tpu.core_type = #tpu.core_type<tc>, window_params = [{transform_indices = @transform_0, window_bounds = array<i64: 1, 8, 8, 4>}, {pipeline_mode = #tpu.pipeline_mode<synchronous>, transform_indices = @transform_1, window_bounds = array<i64: 1, 4, 128>}, {pipeline_mode = #tpu.pipeline_mode<synchronous>, transform_indices = @transform_2, window_bounds = array<i64: 1, 128>}, {transform_indices = @transform_3, window_bounds = array<i64: 1, 64, 128>}]} {
    %c0 = arith.constant 0 : index
    %c0_0 = arith.constant 0 : index
    %c0_1 = arith.constant 0 : index
    %c0_2 = arith.constant 0 : index
    %0 = vector.load %arg1[%c0, %c0_0, %c0_1, %c0_2] : memref<1x8x8x4xbf16, #tpu.memory_space<vmem>>, vector<1x8x8x4xbf16>
    %1 = vector.shape_cast %0 : vector<1x8x8x4xbf16> to vector<8x8x4xbf16>
    %cst = arith.constant 0.000000e+00 : f32
    %2 = vector.broadcast %cst : f32 to vector<64x128xf32>
    %3 = vector.shape_cast %1 : vector<8x8x4xbf16> to vector<64x4xbf16>
    %c0_3 = arith.constant 0 : index
    %c0_4 = arith.constant 0 : index
    %c0_5 = arith.constant 0 : index
    %4 = vector.load %arg2[%c0_3, %c0_4, %c0_5] : memref<1x4x128xbf16, #tpu.memory_space<vmem>>, vector<1x4x128xbf16>
    %5 = vector.shape_cast %4 : vector<1x4x128xbf16> to vector<4x128xbf16>
    %cst_6 = arith.constant dense<0.000000e+00> : vector<64x128xf32>
    %6 = tpu.matmul %3, %5, %cst_6 {dimension_numbers = #tpu.dot_dimension_numbers<[1], [0], [0], [1], [0, 0, 1, 1], [], []>} : vector<64x4xbf16>, vector<4x128xbf16>, vector<64x128xf32> -> vector<64x128xf32>
    %7 = arith.addf %2, %6 : vector<64x128xf32>
    %c0_7 = arith.constant 0 : index
    %c0_8 = arith.constant 0 : index
    %8 = vector.load %arg3[%c0_7, %c0_8] : memref<1x128xf32, #tpu.memory_space<vmem>>, vector<1x128xf32>
    %9 = vector.broadcast %8 : vector<1x128xf32> to vector<64x128xf32>
    %10 = arith.addf %7, %9 : vector<64x128xf32>
    %c0_9 = arith.constant 0 : index
    %c0_10 = arith.constant 0 : index
    %c0_11 = arith.constant 0 : index
    %11 = vector.load %arg4[%c0_9, %c0_10, %c0_11] : memref<1x64x128xf32, #tpu.memory_space<vmem>>, vector<1x64x128xf32>
    %12 = vector.shape_cast %11 : vector<1x64x128xf32> to vector<64x128xf32>
    %13 = vector.shape_cast %10 : vector<64x128xf32> to vector<1x64x128xf32>
    tpu.vector_store %arg4[%c0_9, %c0_10, %c0_11], %13 {strides = array<i32>} : memref<1x64x128xf32, #tpu.memory_space<vmem>>, vector<1x64x128xf32>,
    return
  }
  func.func @transform_0(%arg0: i32) -> (i32, i32, i32, i32) {
    %c0_i32 = arith.constant 0 : i32
    %c0_i32_0 = arith.constant 0 : i32
    %c0_i32_1 = arith.constant 0 : i32
    %c0_i32_2 = arith.constant 0 : i32
    return %arg0, %c0_i32, %c0_i32_0, %c0_i32_1 : i32, i32, i32, i32
  }
  func.func @transform_1(%arg0: i32) -> (i32, i32, i32) {
    %c0_i32 = arith.constant 0 : i32
    %c0_i32_0 = arith.constant 0 : i32
    %c0_i32_1 = arith.constant 0 : i32
    %c0_i32_2 = arith.constant 0 : i32
    return %c0_i32, %c0_i32_0, %c0_i32_1 : i32, i32, i32
  }
  func.func @transform_2(%arg0: i32) -> (i32, i32) {
    %c0_i32 = arith.constant 0 : i32
    %c0_i32_0 = arith.constant 0 : i32
    %c0_i32_1 = arith.constant 0 : i32
    return %c0_i32, %c0_i32_0 : i32, i32
  }
  func.func @transform_3(%arg0: i32) -> (i32, i32, i32) {
    %c0_i32 = arith.constant 0 : i32
    %c0_i32_0 = arith.constant 0 : i32
    %c0_i32_1 = arith.constant 0 : i32
    return %arg0, %c0_i32, %c0_i32_0 : i32, i32, i32
  }
}

module attributes {stable_mosaic.version = 11 : i64} {
  func.func @_conv_bn_kernel(%arg0: i32, %arg1: memref<1x36x9x4xbf16, #tpu.memory_space<vmem>>, %arg2: memref<9x4x128xbf16, #tpu.memory_space<vmem>>, %arg3: memref<1x128xf32, #tpu.memory_space<vmem>>, %arg4: memref<1x64x128xbf16, #tpu.memory_space<vmem>>) attributes {dimension_semantics = [#tpu.dimension_semantics<parallel>], iteration_bounds = array<i64: 2>, scalar_prefetch = 0 : i64, scratch_operands = 0 : i64, tpu.core_type = #tpu.core_type<tc>, window_params = [{transform_indices = @transform_0, window_bounds = array<i64: 1, 36, 9, 4>}, {pipeline_mode = #tpu.pipeline_mode<synchronous>, transform_indices = @transform_1, window_bounds = array<i64: 9, 4, 128>}, {pipeline_mode = #tpu.pipeline_mode<synchronous>, transform_indices = @transform_2, window_bounds = array<i64: 1, 128>}, {transform_indices = @transform_3, window_bounds = array<i64: 1, 64, 128>}]} {
    %c0 = arith.constant 0 : index
    %c0_0 = arith.constant 0 : index
    %c0_1 = arith.constant 0 : index
    %c0_2 = arith.constant 0 : index
    %0 = vector.load %arg1[%c0, %c0_0, %c0_1, %c0_2] : memref<1x36x9x4xbf16, #tpu.memory_space<vmem>>, vector<1x36x9x4xbf16>
    %1 = vector.shape_cast %0 : vector<1x36x9x4xbf16> to vector<36x9x4xbf16>
    %cst = arith.constant 0.000000e+00 : f32
    %2 = vector.broadcast %cst : f32 to vector<64x128xf32>
    %3 = vector.extract_strided_slice %1 {offsets = [0, 0, 0], sizes = [8, 8, 4], strides = [1, 1, 1]} : vector<36x9x4xbf16> to vector<8x8x4xbf16>
    %4 = vector.shape_cast %3 : vector<8x8x4xbf16> to vector<64x4xbf16>
    %c0_3 = arith.constant 0 : index
    %c0_4 = arith.constant 0 : index
    %c0_5 = arith.constant 0 : index
    %5 = vector.load %arg2[%c0_3, %c0_4, %c0_5] : memref<9x4x128xbf16, #tpu.memory_space<vmem>>, vector<1x4x128xbf16>
    %6 = vector.shape_cast %5 : vector<1x4x128xbf16> to vector<4x128xbf16>
    %cst_6 = arith.constant dense<0.000000e+00> : vector<64x128xf32>
    %7 = tpu.matmul %4, %6, %cst_6 {dimension_numbers = #tpu.dot_dimension_numbers<[1], [0], [0], [1], [0, 0, 1, 1], [], []>} : vector<64x4xbf16>, vector<4x128xbf16>, vector<64x128xf32> -> vector<64x128xf32>
    %8 = arith.addf %2, %7 : vector<64x128xf32>
    %9 = vector.extract_strided_slice %1 {offsets = [9, 0, 0], sizes = [8, 8, 4], strides = [1, 1, 1]} : vector<36x9x4xbf16> to vector<8x8x4xbf16>
    %10 = vector.shape_cast %9 : vector<8x8x4xbf16> to vector<64x4xbf16>
    %c1 = arith.constant 1 : index
    %c0_7 = arith.constant 0 : index
    %c0_8 = arith.constant 0 : index
    %11 = vector.load %arg2[%c1, %c0_7, %c0_8] : memref<9x4x128xbf16, #tpu.memory_space<vmem>>, vector<1x4x128xbf16>
    %12 = vector.shape_cast %11 : vector<1x4x128xbf16> to vector<4x128xbf16>
    %cst_9 = arith.constant dense<0.000000e+00> : vector<64x128xf32>
    %13 = tpu.matmul %10, %12, %cst_9 {dimension_numbers = #tpu.dot_dimension_numbers<[1], [0], [0], [1], [0, 0, 1, 1], [], []>} : vector<64x4xbf16>, vector<4x128xbf16>, vector<64x128xf32> -> vector<64x128xf32>
    %14 = arith.addf %8, %13 : vector<64x128xf32>
    %15 = vector.extract_strided_slice %1 {offsets = [0, 1, 0], sizes = [8, 8, 4], strides = [1, 1, 1]} : vector<36x9x4xbf16> to vector<8x8x4xbf16>
    %16 = vector.shape_cast %15 : vector<8x8x4xbf16> to vector<64x4xbf16>
    %c2 = arith.constant 2 : index
    %c0_10 = arith.constant 0 : index
    %c0_11 = arith.constant 0 : index
    %17 = vector.load %arg2[%c2, %c0_10, %c0_11] : memref<9x4x128xbf16, #tpu.memory_space<vmem>>, vector<1x4x128xbf16>
    %18 = vector.shape_cast %17 : vector<1x4x128xbf16> to vector<4x128xbf16>
    %cst_12 = arith.constant dense<0.000000e+00> : vector<64x128xf32>
    %19 = tpu.matmul %16, %18, %cst_12 {dimension_numbers = #tpu.dot_dimension_numbers<[1], [0], [0], [1], [0, 0, 1, 1], [], []>} : vector<64x4xbf16>, vector<4x128xbf16>, vector<64x128xf32> -> vector<64x128xf32>
    %20 = arith.addf %14, %19 : vector<64x128xf32>
    %21 = vector.extract_strided_slice %1 {offsets = [18, 0, 0], sizes = [8, 8, 4], strides = [1, 1, 1]} : vector<36x9x4xbf16> to vector<8x8x4xbf16>
    %22 = vector.shape_cast %21 : vector<8x8x4xbf16> to vector<64x4xbf16>
    %c3 = arith.constant 3 : index
    %c0_13 = arith.constant 0 : index
    %c0_14 = arith.constant 0 : index
    %23 = vector.load %arg2[%c3, %c0_13, %c0_14] : memref<9x4x128xbf16, #tpu.memory_space<vmem>>, vector<1x4x128xbf16>
    %24 = vector.shape_cast %23 : vector<1x4x128xbf16> to vector<4x128xbf16>
    %cst_15 = arith.constant dense<0.000000e+00> : vector<64x128xf32>
    %25 = tpu.matmul %22, %24, %cst_15 {dimension_numbers = #tpu.dot_dimension_numbers<[1], [0], [0], [1], [0, 0, 1, 1], [], []>} : vector<64x4xbf16>, vector<4x128xbf16>, vector<64x128xf32> -> vector<64x128xf32>
    %26 = arith.addf %20, %25 : vector<64x128xf32>
    %27 = vector.extract_strided_slice %1 {offsets = [27, 0, 0], sizes = [8, 8, 4], strides = [1, 1, 1]} : vector<36x9x4xbf16> to vector<8x8x4xbf16>
    %28 = vector.shape_cast %27 : vector<8x8x4xbf16> to vector<64x4xbf16>
    %c4 = arith.constant 4 : index
    %c0_16 = arith.constant 0 : index
    %c0_17 = arith.constant 0 : index
    %29 = vector.load %arg2[%c4, %c0_16, %c0_17] : memref<9x4x128xbf16, #tpu.memory_space<vmem>>, vector<1x4x128xbf16>
    %30 = vector.shape_cast %29 : vector<1x4x128xbf16> to vector<4x128xbf16>
    %cst_18 = arith.constant dense<0.000000e+00> : vector<64x128xf32>
    %31 = tpu.matmul %28, %30, %cst_18 {dimension_numbers = #tpu.dot_dimension_numbers<[1], [0], [0], [1], [0, 0, 1, 1], [], []>} : vector<64x4xbf16>, vector<4x128xbf16>, vector<64x128xf32> -> vector<64x128xf32>
    %32 = arith.addf %26, %31 : vector<64x128xf32>
    %33 = vector.extract_strided_slice %1 {offsets = [18, 1, 0], sizes = [8, 8, 4], strides = [1, 1, 1]} : vector<36x9x4xbf16> to vector<8x8x4xbf16>
    %34 = vector.shape_cast %33 : vector<8x8x4xbf16> to vector<64x4xbf16>
    %c5 = arith.constant 5 : index
    %c0_19 = arith.constant 0 : index
    %c0_20 = arith.constant 0 : index
    %35 = vector.load %arg2[%c5, %c0_19, %c0_20] : memref<9x4x128xbf16, #tpu.memory_space<vmem>>, vector<1x4x128xbf16>
    %36 = vector.shape_cast %35 : vector<1x4x128xbf16> to vector<4x128xbf16>
    %cst_21 = arith.constant dense<0.000000e+00> : vector<64x128xf32>
    %37 = tpu.matmul %34, %36, %cst_21 {dimension_numbers = #tpu.dot_dimension_numbers<[1], [0], [0], [1], [0, 0, 1, 1], [], []>} : vector<64x4xbf16>, vector<4x128xbf16>, vector<64x128xf32> -> vector<64x128xf32>
    %38 = arith.addf %32, %37 : vector<64x128xf32>
    %39 = vector.extract_strided_slice %1 {offsets = [1, 0, 0], sizes = [8, 8, 4], strides = [1, 1, 1]} : vector<36x9x4xbf16> to vector<8x8x4xbf16>
    %40 = vector.shape_cast %39 : vector<8x8x4xbf16> to vector<64x4xbf16>
    %c6 = arith.constant 6 : index
    %c0_22 = arith.constant 0 : index
    %c0_23 = arith.constant 0 : index
    %41 = vector.load %arg2[%c6, %c0_22, %c0_23] : memref<9x4x128xbf16, #tpu.memory_space<vmem>>, vector<1x4x128xbf16>
    %42 = vector.shape_cast %41 : vector<1x4x128xbf16> to vector<4x128xbf16>
    %cst_24 = arith.constant dense<0.000000e+00> : vector<64x128xf32>
    %43 = tpu.matmul %40, %42, %cst_24 {dimension_numbers = #tpu.dot_dimension_numbers<[1], [0], [0], [1], [0, 0, 1, 1], [], []>} : vector<64x4xbf16>, vector<4x128xbf16>, vector<64x128xf32> -> vector<64x128xf32>
    %44 = arith.addf %38, %43 : vector<64x128xf32>
    %45 = vector.extract_strided_slice %1 {offsets = [10, 0, 0], sizes = [8, 8, 4], strides = [1, 1, 1]} : vector<36x9x4xbf16> to vector<8x8x4xbf16>
    %46 = vector.shape_cast %45 : vector<8x8x4xbf16> to vector<64x4xbf16>
    %c7 = arith.constant 7 : index
    %c0_25 = arith.constant 0 : index
    %c0_26 = arith.constant 0 : index
    %47 = vector.load %arg2[%c7, %c0_25, %c0_26] : memref<9x4x128xbf16, #tpu.memory_space<vmem>>, vector<1x4x128xbf16>
    %48 = vector.shape_cast %47 : vector<1x4x128xbf16> to vector<4x128xbf16>
    %cst_27 = arith.constant dense<0.000000e+00> : vector<64x128xf32>
    %49 = tpu.matmul %46, %48, %cst_27 {dimension_numbers = #tpu.dot_dimension_numbers<[1], [0], [0], [1], [0, 0, 1, 1], [], []>} : vector<64x4xbf16>, vector<4x128xbf16>, vector<64x128xf32> -> vector<64x128xf32>
    %50 = arith.addf %44, %49 : vector<64x128xf32>
    %51 = vector.extract_strided_slice %1 {offsets = [1, 1, 0], sizes = [8, 8, 4], strides = [1, 1, 1]} : vector<36x9x4xbf16> to vector<8x8x4xbf16>
    %52 = vector.shape_cast %51 : vector<8x8x4xbf16> to vector<64x4xbf16>
    %c8 = arith.constant 8 : index
    %c0_28 = arith.constant 0 : index
    %c0_29 = arith.constant 0 : index
    %53 = vector.load %arg2[%c8, %c0_28, %c0_29] : memref<9x4x128xbf16, #tpu.memory_space<vmem>>, vector<1x4x128xbf16>
    %54 = vector.shape_cast %53 : vector<1x4x128xbf16> to vector<4x128xbf16>
    %cst_30 = arith.constant dense<0.000000e+00> : vector<64x128xf32>
    %55 = tpu.matmul %52, %54, %cst_30 {dimension_numbers = #tpu.dot_dimension_numbers<[1], [0], [0], [1], [0, 0, 1, 1], [], []>} : vector<64x4xbf16>, vector<4x128xbf16>, vector<64x128xf32> -> vector<64x128xf32>
    %56 = arith.addf %50, %55 : vector<64x128xf32>
    %c0_31 = arith.constant 0 : index
    %c0_32 = arith.constant 0 : index
    %57 = vector.load %arg3[%c0_31, %c0_32] : memref<1x128xf32, #tpu.memory_space<vmem>>, vector<1x128xf32>
    %58 = vector.broadcast %57 : vector<1x128xf32> to vector<64x128xf32>
    %59 = arith.addf %56, %58 : vector<64x128xf32>
    %cst_33 = arith.constant 0.000000e+00 : f32
    %60 = vector.broadcast %cst_33 : f32 to vector<64x128xf32>
    %61 = arith.maximumf %59, %60 : vector<64x128xf32>
    %62 = arith.truncf %61 : vector<64x128xf32> to vector<64x128xbf16>
    %c0_34 = arith.constant 0 : index
    %c0_35 = arith.constant 0 : index
    %c0_36 = arith.constant 0 : index
    %63 = vector.load %arg4[%c0_34, %c0_35, %c0_36] : memref<1x64x128xbf16, #tpu.memory_space<vmem>>, vector<1x64x128xbf16>
    %64 = vector.shape_cast %63 : vector<1x64x128xbf16> to vector<64x128xbf16>
    %65 = vector.shape_cast %62 : vector<64x128xbf16> to vector<1x64x128xbf16>
    tpu.vector_store %arg4[%c0_34, %c0_35, %c0_36], %65 {strides = array<i32>} : memref<1x64x128xbf16, #tpu.memory_space<vmem>>, vector<1x64x128xbf16>,
    return
  }
  func.func @transform_0(%arg0: i32) -> (i32, i32, i32, i32) {
    %c0_i32 = arith.constant 0 : i32
    %c0_i32_0 = arith.constant 0 : i32
    %c0_i32_1 = arith.constant 0 : i32
    %c0_i32_2 = arith.constant 0 : i32
    return %arg0, %c0_i32, %c0_i32_0, %c0_i32_1 : i32, i32, i32, i32
  }
  func.func @transform_1(%arg0: i32) -> (i32, i32, i32) {
    %c0_i32 = arith.constant 0 : i32
    %c0_i32_0 = arith.constant 0 : i32
    %c0_i32_1 = arith.constant 0 : i32
    %c0_i32_2 = arith.constant 0 : i32
    return %c0_i32, %c0_i32_0, %c0_i32_1 : i32, i32, i32
  }
  func.func @transform_2(%arg0: i32) -> (i32, i32) {
    %c0_i32 = arith.constant 0 : i32
    %c0_i32_0 = arith.constant 0 : i32
    %c0_i32_1 = arith.constant 0 : i32
    return %c0_i32, %c0_i32_0 : i32, i32
  }
  func.func @transform_3(%arg0: i32) -> (i32, i32, i32) {
    %c0_i32 = arith.constant 0 : i32
    %c0_i32_0 = arith.constant 0 : i32
    %c0_i32_1 = arith.constant 0 : i32
    return %arg0, %c0_i32, %c0_i32_0 : i32, i32, i32
  }
}

module attributes {stable_mosaic.version = 11 : i64} {
  func.func @_conv_bn_kernel(%arg0: i32, %arg1: memref<1x10x10x8xbf16, #tpu.memory_space<vmem>>, %arg2: memref<9x8x128xbf16, #tpu.memory_space<vmem>>, %arg3: memref<1x128xf32, #tpu.memory_space<vmem>>, %arg4: memref<1x64x128xf32, #tpu.memory_space<vmem>>, %arg5: memref<1x64x128xf32, #tpu.memory_space<vmem>>) attributes {dimension_semantics = [#tpu.dimension_semantics<parallel>], iteration_bounds = array<i64: 2>, scalar_prefetch = 0 : i64, scratch_operands = 0 : i64, tpu.core_type = #tpu.core_type<tc>, window_params = [{transform_indices = @transform_0, window_bounds = array<i64: 1, 10, 10, 8>}, {pipeline_mode = #tpu.pipeline_mode<synchronous>, transform_indices = @transform_1, window_bounds = array<i64: 9, 8, 128>}, {pipeline_mode = #tpu.pipeline_mode<synchronous>, transform_indices = @transform_2, window_bounds = array<i64: 1, 128>}, {transform_indices = @transform_3, window_bounds = array<i64: 1, 64, 128>}, {transform_indices = @transform_4, window_bounds = array<i64: 1, 64, 128>}]} {
    %c0 = arith.constant 0 : index
    %c0_0 = arith.constant 0 : index
    %c0_1 = arith.constant 0 : index
    %c0_2 = arith.constant 0 : index
    %0 = vector.load %arg1[%c0, %c0_0, %c0_1, %c0_2] : memref<1x10x10x8xbf16, #tpu.memory_space<vmem>>, vector<1x10x10x8xbf16>
    %1 = vector.shape_cast %0 : vector<1x10x10x8xbf16> to vector<10x10x8xbf16>
    %cst = arith.constant 0.000000e+00 : f32
    %2 = vector.broadcast %cst : f32 to vector<64x128xf32>
    %3 = vector.extract_strided_slice %1 {offsets = [0, 0, 0], sizes = [8, 8, 8], strides = [1, 1, 1]} : vector<10x10x8xbf16> to vector<8x8x8xbf16>
    %4 = vector.shape_cast %3 : vector<8x8x8xbf16> to vector<64x8xbf16>
    %c0_3 = arith.constant 0 : index
    %c0_4 = arith.constant 0 : index
    %c0_5 = arith.constant 0 : index
    %5 = vector.load %arg2[%c0_3, %c0_4, %c0_5] : memref<9x8x128xbf16, #tpu.memory_space<vmem>>, vector<1x8x128xbf16>
    %6 = vector.shape_cast %5 : vector<1x8x128xbf16> to vector<8x128xbf16>
    %cst_6 = arith.constant dense<0.000000e+00> : vector<64x128xf32>
    %7 = tpu.matmul %4, %6, %cst_6 {dimension_numbers = #tpu.dot_dimension_numbers<[1], [0], [0], [1], [0, 0, 1, 1], [], []>} : vector<64x8xbf16>, vector<8x128xbf16>, vector<64x128xf32> -> vector<64x128xf32>
    %8 = arith.addf %2, %7 : vector<64x128xf32>
    %9 = vector.extract_strided_slice %1 {offsets = [0, 1, 0], sizes = [8, 8, 8], strides = [1, 1, 1]} : vector<10x10x8xbf16> to vector<8x8x8xbf16>
    %10 = vector.shape_cast %9 : vector<8x8x8xbf16> to vector<64x8xbf16>
    %c1 = arith.constant 1 : index
    %c0_7 = arith.constant 0 : index
    %c0_8 = arith.constant 0 : index
    %11 = vector.load %arg2[%c1, %c0_7, %c0_8] : memref<9x8x128xbf16, #tpu.memory_space<vmem>>, vector<1x8x128xbf16>
    %12 = vector.shape_cast %11 : vector<1x8x128xbf16> to vector<8x128xbf16>
    %cst_9 = arith.constant dense<0.000000e+00> : vector<64x128xf32>
    %13 = tpu.matmul %10, %12, %cst_9 {dimension_numbers = #tpu.dot_dimension_numbers<[1], [0], [0], [1], [0, 0, 1, 1], [], []>} : vector<64x8xbf16>, vector<8x128xbf16>, vector<64x128xf32> -> vector<64x128xf32>
    %14 = arith.addf %8, %13 : vector<64x128xf32>
    %15 = vector.extract_strided_slice %1 {offsets = [0, 2, 0], sizes = [8, 8, 8], strides = [1, 1, 1]} : vector<10x10x8xbf16> to vector<8x8x8xbf16>
    %16 = vector.shape_cast %15 : vector<8x8x8xbf16> to vector<64x8xbf16>
    %c2 = arith.constant 2 : index
    %c0_10 = arith.constant 0 : index
    %c0_11 = arith.constant 0 : index
    %17 = vector.load %arg2[%c2, %c0_10, %c0_11] : memref<9x8x128xbf16, #tpu.memory_space<vmem>>, vector<1x8x128xbf16>
    %18 = vector.shape_cast %17 : vector<1x8x128xbf16> to vector<8x128xbf16>
    %cst_12 = arith.constant dense<0.000000e+00> : vector<64x128xf32>
    %19 = tpu.matmul %16, %18, %cst_12 {dimension_numbers = #tpu.dot_dimension_numbers<[1], [0], [0], [1], [0, 0, 1, 1], [], []>} : vector<64x8xbf16>, vector<8x128xbf16>, vector<64x128xf32> -> vector<64x128xf32>
    %20 = arith.addf %14, %19 : vector<64x128xf32>
    %21 = vector.extract_strided_slice %1 {offsets = [1, 0, 0], sizes = [8, 8, 8], strides = [1, 1, 1]} : vector<10x10x8xbf16> to vector<8x8x8xbf16>
    %22 = vector.shape_cast %21 : vector<8x8x8xbf16> to vector<64x8xbf16>
    %c3 = arith.constant 3 : index
    %c0_13 = arith.constant 0 : index
    %c0_14 = arith.constant 0 : index
    %23 = vector.load %arg2[%c3, %c0_13, %c0_14] : memref<9x8x128xbf16, #tpu.memory_space<vmem>>, vector<1x8x128xbf16>
    %24 = vector.shape_cast %23 : vector<1x8x128xbf16> to vector<8x128xbf16>
    %cst_15 = arith.constant dense<0.000000e+00> : vector<64x128xf32>
    %25 = tpu.matmul %22, %24, %cst_15 {dimension_numbers = #tpu.dot_dimension_numbers<[1], [0], [0], [1], [0, 0, 1, 1], [], []>} : vector<64x8xbf16>, vector<8x128xbf16>, vector<64x128xf32> -> vector<64x128xf32>
    %26 = arith.addf %20, %25 : vector<64x128xf32>
    %27 = vector.extract_strided_slice %1 {offsets = [1, 1, 0], sizes = [8, 8, 8], strides = [1, 1, 1]} : vector<10x10x8xbf16> to vector<8x8x8xbf16>
    %28 = vector.shape_cast %27 : vector<8x8x8xbf16> to vector<64x8xbf16>
    %c4 = arith.constant 4 : index
    %c0_16 = arith.constant 0 : index
    %c0_17 = arith.constant 0 : index
    %29 = vector.load %arg2[%c4, %c0_16, %c0_17] : memref<9x8x128xbf16, #tpu.memory_space<vmem>>, vector<1x8x128xbf16>
    %30 = vector.shape_cast %29 : vector<1x8x128xbf16> to vector<8x128xbf16>
    %cst_18 = arith.constant dense<0.000000e+00> : vector<64x128xf32>
    %31 = tpu.matmul %28, %30, %cst_18 {dimension_numbers = #tpu.dot_dimension_numbers<[1], [0], [0], [1], [0, 0, 1, 1], [], []>} : vector<64x8xbf16>, vector<8x128xbf16>, vector<64x128xf32> -> vector<64x128xf32>
    %32 = arith.addf %26, %31 : vector<64x128xf32>
    %33 = vector.extract_strided_slice %1 {offsets = [1, 2, 0], sizes = [8, 8, 8], strides = [1, 1, 1]} : vector<10x10x8xbf16> to vector<8x8x8xbf16>
    %34 = vector.shape_cast %33 : vector<8x8x8xbf16> to vector<64x8xbf16>
    %c5 = arith.constant 5 : index
    %c0_19 = arith.constant 0 : index
    %c0_20 = arith.constant 0 : index
    %35 = vector.load %arg2[%c5, %c0_19, %c0_20] : memref<9x8x128xbf16, #tpu.memory_space<vmem>>, vector<1x8x128xbf16>
    %36 = vector.shape_cast %35 : vector<1x8x128xbf16> to vector<8x128xbf16>
    %cst_21 = arith.constant dense<0.000000e+00> : vector<64x128xf32>
    %37 = tpu.matmul %34, %36, %cst_21 {dimension_numbers = #tpu.dot_dimension_numbers<[1], [0], [0], [1], [0, 0, 1, 1], [], []>} : vector<64x8xbf16>, vector<8x128xbf16>, vector<64x128xf32> -> vector<64x128xf32>
    %38 = arith.addf %32, %37 : vector<64x128xf32>
    %39 = vector.extract_strided_slice %1 {offsets = [2, 0, 0], sizes = [8, 8, 8], strides = [1, 1, 1]} : vector<10x10x8xbf16> to vector<8x8x8xbf16>
    %40 = vector.shape_cast %39 : vector<8x8x8xbf16> to vector<64x8xbf16>
    %c6 = arith.constant 6 : index
    %c0_22 = arith.constant 0 : index
    %c0_23 = arith.constant 0 : index
    %41 = vector.load %arg2[%c6, %c0_22, %c0_23] : memref<9x8x128xbf16, #tpu.memory_space<vmem>>, vector<1x8x128xbf16>
    %42 = vector.shape_cast %41 : vector<1x8x128xbf16> to vector<8x128xbf16>
    %cst_24 = arith.constant dense<0.000000e+00> : vector<64x128xf32>
    %43 = tpu.matmul %40, %42, %cst_24 {dimension_numbers = #tpu.dot_dimension_numbers<[1], [0], [0], [1], [0, 0, 1, 1], [], []>} : vector<64x8xbf16>, vector<8x128xbf16>, vector<64x128xf32> -> vector<64x128xf32>
    %44 = arith.addf %38, %43 : vector<64x128xf32>
    %45 = vector.extract_strided_slice %1 {offsets = [2, 1, 0], sizes = [8, 8, 8], strides = [1, 1, 1]} : vector<10x10x8xbf16> to vector<8x8x8xbf16>
    %46 = vector.shape_cast %45 : vector<8x8x8xbf16> to vector<64x8xbf16>
    %c7 = arith.constant 7 : index
    %c0_25 = arith.constant 0 : index
    %c0_26 = arith.constant 0 : index
    %47 = vector.load %arg2[%c7, %c0_25, %c0_26] : memref<9x8x128xbf16, #tpu.memory_space<vmem>>, vector<1x8x128xbf16>
    %48 = vector.shape_cast %47 : vector<1x8x128xbf16> to vector<8x128xbf16>
    %cst_27 = arith.constant dense<0.000000e+00> : vector<64x128xf32>
    %49 = tpu.matmul %46, %48, %cst_27 {dimension_numbers = #tpu.dot_dimension_numbers<[1], [0], [0], [1], [0, 0, 1, 1], [], []>} : vector<64x8xbf16>, vector<8x128xbf16>, vector<64x128xf32> -> vector<64x128xf32>
    %50 = arith.addf %44, %49 : vector<64x128xf32>
    %51 = vector.extract_strided_slice %1 {offsets = [2, 2, 0], sizes = [8, 8, 8], strides = [1, 1, 1]} : vector<10x10x8xbf16> to vector<8x8x8xbf16>
    %52 = vector.shape_cast %51 : vector<8x8x8xbf16> to vector<64x8xbf16>
    %c8 = arith.constant 8 : index
    %c0_28 = arith.constant 0 : index
    %c0_29 = arith.constant 0 : index
    %53 = vector.load %arg2[%c8, %c0_28, %c0_29] : memref<9x8x128xbf16, #tpu.memory_space<vmem>>, vector<1x8x128xbf16>
    %54 = vector.shape_cast %53 : vector<1x8x128xbf16> to vector<8x128xbf16>
    %cst_30 = arith.constant dense<0.000000e+00> : vector<64x128xf32>
    %55 = tpu.matmul %52, %54, %cst_30 {dimension_numbers = #tpu.dot_dimension_numbers<[1], [0], [0], [1], [0, 0, 1, 1], [], []>} : vector<64x8xbf16>, vector<8x128xbf16>, vector<64x128xf32> -> vector<64x128xf32>
    %56 = arith.addf %50, %55 : vector<64x128xf32>
    %c0_31 = arith.constant 0 : index
    %c0_32 = arith.constant 0 : index
    %57 = vector.load %arg3[%c0_31, %c0_32] : memref<1x128xf32, #tpu.memory_space<vmem>>, vector<1x128xf32>
    %58 = vector.broadcast %57 : vector<1x128xf32> to vector<64x128xf32>
    %59 = arith.addf %56, %58 : vector<64x128xf32>
    %c0_33 = arith.constant 0 : index
    %c0_34 = arith.constant 0 : index
    %c0_35 = arith.constant 0 : index
    %60 = vector.load %arg4[%c0_33, %c0_34, %c0_35] : memref<1x64x128xf32, #tpu.memory_space<vmem>>, vector<1x64x128xf32>
    %61 = vector.shape_cast %60 : vector<1x64x128xf32> to vector<64x128xf32>
    %62 = arith.addf %59, %61 : vector<64x128xf32>
    %cst_36 = arith.constant 0.000000e+00 : f32
    %63 = vector.broadcast %cst_36 : f32 to vector<64x128xf32>
    %64 = arith.maximumf %62, %63 : vector<64x128xf32>
    %c0_37 = arith.constant 0 : index
    %c0_38 = arith.constant 0 : index
    %c0_39 = arith.constant 0 : index
    %65 = vector.load %arg5[%c0_37, %c0_38, %c0_39] : memref<1x64x128xf32, #tpu.memory_space<vmem>>, vector<1x64x128xf32>
    %66 = vector.shape_cast %65 : vector<1x64x128xf32> to vector<64x128xf32>
    %67 = vector.shape_cast %64 : vector<64x128xf32> to vector<1x64x128xf32>
    tpu.vector_store %arg5[%c0_37, %c0_38, %c0_39], %67 {strides = array<i32>} : memref<1x64x128xf32, #tpu.memory_space<vmem>>, vector<1x64x128xf32>,
    return
  }
  func.func @transform_0(%arg0: i32) -> (i32, i32, i32, i32) {
    %c0_i32 = arith.constant 0 : i32
    %c0_i32_0 = arith.constant 0 : i32
    %c0_i32_1 = arith.constant 0 : i32
    %c0_i32_2 = arith.constant 0 : i32
    return %arg0, %c0_i32, %c0_i32_0, %c0_i32_1 : i32, i32, i32, i32
  }
  func.func @transform_1(%arg0: i32) -> (i32, i32, i32) {
    %c0_i32 = arith.constant 0 : i32
    %c0_i32_0 = arith.constant 0 : i32
    %c0_i32_1 = arith.constant 0 : i32
    %c0_i32_2 = arith.constant 0 : i32
    return %c0_i32, %c0_i32_0, %c0_i32_1 : i32, i32, i32
  }
  func.func @transform_2(%arg0: i32) -> (i32, i32) {
    %c0_i32 = arith.constant 0 : i32
    %c0_i32_0 = arith.constant 0 : i32
    %c0_i32_1 = arith.constant 0 : i32
    return %c0_i32, %c0_i32_0 : i32, i32
  }
  func.func @transform_3(%arg0: i32) -> (i32, i32, i32) {
    %c0_i32 = arith.constant 0 : i32
    %c0_i32_0 = arith.constant 0 : i32
    %c0_i32_1 = arith.constant 0 : i32
    return %arg0, %c0_i32, %c0_i32_0 : i32, i32, i32
  }
  func.func @transform_4(%arg0: i32) -> (i32, i32, i32) {
    %c0_i32 = arith.constant 0 : i32
    %c0_i32_0 = arith.constant 0 : i32
    %c0_i32_1 = arith.constant 0 : i32
    return %arg0, %c0_i32, %c0_i32_0 : i32, i32, i32
  }
}

</mosaic_0001>

<bundles_post_ra>
// kernel: basic_block_forward.4
= control target key start
LH: loop header
LB: loop body
LE: loop exit
PB: predicated region body
PF: predicated region fallthrough
CT: control target
= control target key end

     0   :  { %s434_s12 = smov 0   ;;  %s457_s0 = inlined_call_operand.vmem [shape: bf16[2,8,8,4], index: 0, kind: input, shape index: {}]   ;;  %s458_s1 = inlined_call_operand.vmem [shape: bf16[1,4,128], index: 1, kind: input, shape index: {}]   ;;  %s459_s2 = inlined_call_operand.vmem [shape: f32[1,128], index: 2, kind: input, shape index: {}]   ;;  %s460_s3 = inlined_call_operand.vmem [shape: f32[2,64,128], index: 3, kind: output, shape index: {}]  }
   0x1 LB: > { %s353_s13 = sadd.s32 4294967295, %s412_s12   ;;  %p357_p0 = scmp.ge.s32.totalorder %s412_s12, 1  ;;  %s412_s12 = sphi %s434_s12, %s13_s12  }
   0x2   : > { %p137_p1 = scmp.lt.s32.totalorder %s412_s12, 3 }
   0x4   : > { %p138_p2 = pnand %p357_p0, %p137_p1 }
   0x5   : > { %p161_p3 = scmp.lt.s32.totalorder (!%p138_p2), %s353_s13, 1 }
   0x6   : > { %141 = sbr.rel (%p138_p2) target bundleno = 218 (0xda), region = 32 }
   0xb   : > { %v180_v0 = vld [vmem:[%s458_s1] sm:$0x3]  ;;  %vm221_vm0 = vcmask 1041408   ;;  %s462_s13 = smov (!%p161_p3, %s353_s13), 1  ;;  %vm208_vm1 = vcmask 31744  }
   0xc   : > { %392 = vmatprep.subr.msk.bf16.mxu0 %vm221_vm0, %v180_v0  ;;  %393 = vmatprep.subr.msk.bf16.mxu1 %vm221_vm0, %v180_v0  ;;  %v223_v1 = vsel %vm221_vm0, %v180_v0, 0  ;;  %s373_s16 = sshll.u32 %s462_s13, 5  ;;  %s374_s20 = sshll.u32 %s462_s13, 6  ;;  %v362_v6 = vld [vmem:[%s459_s2] ss:$0 sm:$0xff] }
   0xd   : > { %381 = vmatpush3.bf16.msra.mxu0 %v223_v1  ;;  %391 = vmatpush3.bf16.msra.mxu1 %v223_v1  ;;  %s165_s19 = scalar_lea.vmem %s457_s0, %s373_s16  ;;  %s170_s25 = scalar_lea.vmem %s460_s3, %s374_s20 }
   0xe   : > { %v402_v2 = vld [vmem:[%s165_s19] sm:$0xff]   ;;  %v403_v3 = vld [vmem:[%s165_s19 + $0x10] sm:$0xff]   ;;  %v404_v4 = vld [vmem:[%s165_s19 + $0x8] sm:$0xff]  }
   0xf   : > { %382 = vmatprep.mubr.msk.bf16.mxu0 %vm208_vm1, %v402_v2  ;;  %386 = vmatprep.mubr.msk.bf16.mxu1 %vm208_vm1, %v403_v3  ;;  %v405_v5 = vld [vmem:[%s165_s19 + $0x18] sm:$0xff]  }
  0x10   : > { %383 = vmatmul.mubr.msk.bf16.vlgmr.msra.gmra.mxu0 %vm208_vm1, %v404_v4  ;;  %387 = vmatmul.mubr.msk.bf16.vlgmr.msra.gmra.mxu1 %vm208_vm1, %v405_v5 }
  0xd0   : > { %v384_v7 = vpop.f32.mrf.mxu0  ;;  %v388_v9 = vpop.f32.mrf.mxu1 }
  0xd1   : > { %v268_v8 = vadd.f32 %v384_v7, %v362_v6  ;;  %v284_v10 = vadd.f32 %v388_v9, %v362_v6 }
  0xd2   : > { %v259_v11 = vpop.f32.mrf.mxu0  ;;  %v275_v13 = vpop.f32.mrf.mxu1 }
  0xd3   : > { %292 = vst [vmem:[%s170_s25 + $0x10] sm:$0xff] %v268_v8  ;;  %v260_v12 = vadd.f32 %v362_v6, %v259_v11  ;;  %296 = vst [vmem:[%s170_s25 + $0x30] sm:$0xff] %v284_v10  ;;  %v276_v14 = vadd.f32 %v362_v6, %v275_v13 }
  0xd4   : > { %v385_v15 = vpop.f32.mrf.mxu0  ;;  %v389_v17 = vpop.f32.mrf.mxu1 }
  0xd5   : > { %290 = vst [vmem:[%s170_s25] sm:$0xff] %v260_v12  ;;  %v271_v16 = vadd.f32 %v385_v15, %v362_v6  ;;  %294 = vst [vmem:[%s170_s25 + $0x20] sm:$0xff] %v276_v14  ;;  %v287_v18 = vadd.f32 %v389_v17, %v362_v6 }
  0xd6   : > { %v262_v19 = vpop.f32.mrf.mxu0  ;;  %v278_v21 = vpop.f32.mrf.mxu1 }
  0xd7   : > { %293 = vst [vmem:[%s170_s25 + $0x18] sm:$0xff] %v271_v16  ;;  %v263_v20 = vadd.f32 %v362_v6, %v262_v19  ;;  %297 = vst [vmem:[%s170_s25 + $0x38] sm:$0xff] %v287_v18  ;;  %v279_v22 = vadd.f32 %v362_v6, %v278_v21 }
  0xd9   : > { %291 = vst [vmem:[%s170_s25 + $0x8] sm:$0xff] %v263_v20  ;;  %295 = vst [vmem:[%s170_s25 + $0x28] sm:$0xff] %v279_v22 }
  0xda PF: > { %s13_s12 = sadd.s32 1, %s412_s12  }
  0xdb   : > { %p10_p4 = scmp.ge.s32.totalorder %s13_s12, 4  }
  0xdd   :  { %12 = sbr.rel (!%p10_p4) target bundleno = 1 (0x1), region = 62 }

// kernel: basic_block_forward.3
= control target key start
LH: loop header
LB: loop body
LE: loop exit
PB: predicated region body
PF: predicated region fallthrough
CT: control target
= control target key end

     0   :  { %s1837_s12 = smov 0   ;;  %s2158_s0 = inlined_call_operand.vmem [shape: bf16[2,36,9,4], index: 0, kind: input, shape index: {}]   ;;  %s2159_s1 = inlined_call_operand.vmem [shape: bf16[9,4,128], index: 1, kind: input, shape index: {}]   ;;  %s2160_s2 = inlined_call_operand.vmem [shape: f32[1,128], index: 2, kind: input, shape index: {}]   ;;  %s2161_s3 = inlined_call_operand.vmem [shape: bf16[2,64,128], index: 3, kind: output, shape index: {}]  }
   0x1 LB: > { %s1498_s13 = sadd.s32 4294967295, %s1815_s12   ;;  %p1502_p0 = scmp.ge.s32.totalorder %s1815_s12, 1  ;;  %s1815_s12 = sphi %s1837_s12, %s13_s12  }
   0x2   : > { %p137_p1 = scmp.lt.s32.totalorder %s1815_s12, 3 }
   0x4   : > { %p138_p2 = pnand %p1502_p0, %p137_p1 }
   0x5   : > { %p161_p3 = scmp.lt.s32.totalorder (!%p138_p2), %s1498_s13, 1 }
   0x6   : > { %141 = sbr.rel (%p138_p2) target bundleno = 300 (0x12c), region = 32 }
   0xb   : > { %v1506_v0 = vld [vmem:[%s2159_s1 + $0x2] sm:$0x3]  ;;  %vm259_vm0 = vcmask 1041408   ;;  %v223_v2 = vld [vmem:[%s2159_s1] sm:$0x3]  ;;  %s2165_s13 = smov (!%p161_p3, %s1498_s13), 1 }
   0xc   : > { %1767 = vmatprep.subr.msk.bf16.mxu1 %vm259_vm0, %v1506_v0  ;;  %1766 = vmatprep.subr.msk.bf16.mxu0 %vm259_vm0, %v1506_v0  ;;  %v261_v1 = vsel %vm259_vm0, %v1506_v0, 0  ;;  %v1523_v3 = vld [vmem:[%s2159_s1 + $0x4] sm:$0x3]  ;;  %v1532_v4 = vld [vmem:[%s2159_s1 + $0x6] sm:$0x3]  ;;  %s1776_s22 = smul.u32 288, %s2165_s13 }
   0xd   : > { %1765 = vmatpush3.bf16.msra.mxu1 %v261_v1  ;;  %1675 = vmatpush3.bf16.msra.mxu0 %v261_v1  ;;  %vm246_vm1 = vcmask 31744   ;;  %v361_v5 = vsel %vm259_vm0, %v223_v2, 0  ;;  %v570_v6 = vsel %vm259_vm0, %v1523_v3, 0  ;;  %vm428_vm2 = vsmask.f32 3328  ;;  %s1597_s11 = sshll.u32 %s2165_s13, 5 }
   0xe   : > { %1768 = vmatprep.subr.msk.bf16.mxu1 %vm259_vm0, %v223_v2  ;;  %1769 = vmatprep.subr.msk.bf16.mxu0 %vm259_vm0, %v1523_v3  ;;  %s1869_s25 = scalar_lea.vmem %s2158_s0, %s1776_s22  ;;  %vm429_vm3 = vsmask.f32 7440  ;;  %v1873_v7 = vsel %vm259_vm0, %v1532_v4, 0  ;;  %v1541_v11 = vld [vmem:[%s2159_s1 + $0x8] sm:$0x3]  ;;  %s170_s16 = scalar_lea.vmem %s2161_s3, %s1597_s11 }
   0xf   : > { %v190_v8 = vld [vmem:[%s1869_s25 + $0x48] sm:$0xf]  ;;  %v1877_v9 = vld [vmem:[%s1869_s25 + $0x50] sm:$0xf]  ;;  %v1880_v10 = vld [vmem:[%s1869_s25 + $0x58] sm:$0xf] }
  0x10   : > { %v1507_v12 = vcombine.low %v190_v8, %v1877_v9  ;;  %v1887_v13 = vld [vmem:[%s1869_s25 + $0x60] sm:$0xf]  ;;  %v1890_v14 = vld [vmem:[%s1869_s25 + $0x68] sm:$0xf]  ;;  %v1893_v15 = vld [vmem:[%s1869_s25 + $0x70] sm:$0xf] }
  0x11   : > { %v1896_v16 = vld [vmem:[%s1869_s25 + $0x78] sm:$0xf]  ;;  %v1899_v17 = vld [vmem:[%s1869_s25 + $0x80] sm:$0xf]  ;;  %v1508_v18 = vcombine.low %v1880_v10, %v1887_v13  ;;  %v1509_v19 = vcombine.low %v1890_v14, %v1893_v15  ;;  %v1910_v22 = vld [vmem:[%s1869_s25 + $0x8] sm:$0xf] }
  0x12   : > { %v172_v20 = vld [vmem:[%s1869_s25] sm:$0xf]  ;;  %1676 = vmatprep.mubr.msk.bf16.mxu0 %vm246_vm1, %v1507_v12  ;;  %v1510_v21 = vcombine.low %v1896_v16, %v1899_v17  ;;  %v1913_v25 = vld [vmem:[%s1869_s25 + $0x10] sm:$0xf]  ;;  %v446_v27 = vshrl.u32 %v1910_v22, 16  ;;  %v449_v28 = vshll.u32 %v1910_v22, 16  ;;  %vm1942_vm4 = vmor %vm428_vm2, %vm429_vm3 }
  0x13   : > { %v432_v23 = vshrl.u32 %v172_v20, 16  ;;  %v435_v24 = vshll.u32 %v172_v20, 16  ;;  %1680 = vmatprep.mubr.msk.bf16.mxu1 %vm246_vm1, %v1509_v19  ;;  %1677 = vmatmul.mubr.msk.bf16.vlgmr.msra.gmra.mxu0 %vm246_vm1, %v1508_v18  ;;  %v1515_v26 = vcombine.low %v172_v20, %v1910_v22  ;;  %v1921_v29 = vld [vmem:[%s1869_s25 + $0x18] sm:$0xf]  ;;  %v460_v30 = vshrl.u32 %v1913_v25, 16 }
  0x14   : > { %1681 = vmatmul.mubr.msk.bf16.vlgmr.msra.gmra.mxu1 %vm246_vm1, %v1510_v21  ;;  %1695 = vmatpush3.bf16.msra.mxu0 %v570_v6  ;;  %v463_v33 = vshll.u32 %v1913_v25, 16  ;;  %v173_v34 = vld [vmem:[%s1869_s25 + $0x4] sm:$0x1]  ;;  %v1928_v35 = vsel %vm259_vm0, %v1541_v11, 0  ;;  %v474_v36 = vshrl.u32 %v1921_v29, 16  ;;  %v477_v37 = vshll.u32 %v1921_v29, 16 }
  0x15   : > { %v434_v31 = vrot.slane %v432_v23, 4  ;;  %v437_v32 = vrot.slane %v435_v24, 5  ;;  %1685 = vmatpush3.bf16.msra.mxu1 %v361_v5  ;;  %1686 = vmatprep.mubr.msk.bf16.mxu1 %vm246_vm1, %v1515_v26  ;;  %v175_v38 = vld [vmem:[%s1869_s25 + $0xc] sm:$0x1]  ;;  %v441_v39 = vshll.u32 %v173_v34, 16  ;;  %v448_v40 = vrot.slane %v446_v27, 4 }
  0x16   : > { %1770 = vmatprep.subr.msk.bf16.mxu1 %vm259_vm0, %v1532_v4  ;;  %v1516_v41 = vcombine.low %v1913_v25, %v1921_v29  ;;  %v451_v43 = vrot.slane %v449_v28, 5  ;;  %v455_v44 = vshll.u32 %v175_v38, 16  ;;  %v177_v45 = vld [vmem:[%s1869_s25 + $0x14] sm:$0x1]  ;;  %v179_v46 = vld [vmem:[%s1869_s25 + $0x1c] sm:$0x1]  ;;  %1771 = vmatprep.subr.msk.bf16.mxu0 %vm259_vm0, %v1541_v11 }
  0x17   : > { %v438_v42 = vor.u32 %v437_v32, %v434_v31  ;;  %v443_v48 = vrot.slane %v441_v39, 5  ;;  %v462_v49 = vrot.slane %v460_v30, 4  ;;  %v465_v50 = vrot.slane %v463_v33, 5  ;;  %v1947_v52 = vld [vmem:[%s1869_s25 + $0x20] sm:$0xf] }
  0x18   : > { %v469_v51 = vshll.u32 %v177_v45, 16  ;;  %v452_v54 = vor.u32 %v451_v43, %v448_v40  ;;  %v457_v55 = vrot.slane %v455_v44, 5  ;;  %v476_v56 = vrot.slane %v474_v36, 4  ;;  %v1550_v57 = vld [vmem:[%s2159_s1 + $0xa] sm:$0x3] }
  0x19   : > { %v439_v53 = vrot.slane %v438_v42, 4  ;;  %v466_v58 = vor.u32 %v465_v50, %v462_v49  ;;  %v479_v60 = vrot.slane %v477_v37, 5  ;;  %v483_v61 = vshll.u32 %v179_v46, 16  ;;  %v1953_v62 = vld [vmem:[%s1869_s25 + $0x28] sm:$0xf] }
  0x1a   : > { %v471_v59 = vrot.slane %v469_v51, 5  ;;  %v453_v0 = vrot.slane %v452_v54, 4  ;;  %v1517_v1 = vcombine.low %v1947_v52, %v1953_v62  ;;  %v488_v2 = vshrl.u32 %v1947_v52, 16  ;;  %v1961_v3 = vld [vmem:[%s1869_s25 + $0x30] sm:$0xf] }
  0x1b   : > { %v444_v63 = vsel %vm1942_vm4, %v439_v53, %v443_v48  ;;  %v467_v4 = vrot.slane %v466_v58, 4  ;;  %v480_v5 = vor.u32 %v479_v60, %v476_v56  ;;  %v485_v6 = vrot.slane %v483_v61, 5  ;;  %v1965_v11 = vld [vmem:[%s1869_s25 + $0x38] sm:$0xf]  ;;  %v181_v20 = vld [vmem:[%s1869_s25 + $0x24] sm:$0x1] }
  0x1c   : > { %v491_v8 = vshll.u32 %v1947_v52, 16  ;;  %1687 = vmatmul.mubr.msk.bf16.vlgmr.msra.gmra.mxu1 %vm246_vm1, %v1516_v41  ;;  %v1970_v12 = vsel %vm1942_vm4, %v453_v0, %v457_v55  ;;  %v502_v18 = vshrl.u32 %v1953_v62, 16  ;;  %v505_v19 = vshll.u32 %v1953_v62, 16  ;;  %v183_v28 = vld [vmem:[%s1869_s25 + $0x2c] sm:$0x1] }
  0x1d   : > { %v1976_v21 = vsel %vm259_vm0, %v1550_v57, 0  ;;  %v1524_v23 = vcombine.low %v444_v63, %v1970_v12  ;;  %1705 = vmatpush3.bf16.msra.mxu1 %v1873_v7  ;;  %v1982_v24 = vsel %vm1942_vm4, %v467_v4, %v471_v59  ;;  %v481_v26 = vrot.slane %v480_v5, 4  ;;  %1690 = vmatprep.mubr.msk.bf16.mxu1 %vm246_vm1, %v1517_v1  ;;  %v185_v30 = vld [vmem:[%s1869_s25 + $0x34] sm:$0x1]  ;;  %v187_v34 = vld [vmem:[%s1869_s25 + $0x3c] sm:$0x1] }
  0x1e   : > { %v1518_v27 = vcombine.low %v1961_v3, %v1965_v11  ;;  %v516_v31 = vshrl.u32 %v1961_v3, 16  ;;  %v519_v32 = vshll.u32 %v1961_v3, 16  ;;  %v530_v7 = vshrl.u32 %v1965_v11, 16  ;;  %1772 = vmatprep.subr.msk.bf16.mxu1 %vm259_vm0, %v1550_v57  ;;  %v199_v40 = vld [vmem:[%s1869_s25 + $0x90] sm:$0xf] }
  0x1f   : > { %v533_v33 = vshll.u32 %v1965_v11, 16  ;;  %1696 = vmatprep.mubr.msk.bf16.mxu0 %vm246_vm1, %v1524_v23  ;;  %v1998_v36 = vsel %vm1942_vm4, %v481_v26, %v485_v6  ;;  %v490_v37 = vrot.slane %v488_v2, 4  ;;  %v493_v38 = vrot.slane %v491_v8, 5  ;;  %v201_v41 = vld [vmem:[%s1869_s25 + $0x98] sm:$0xf] }
  0x20   : > { %v497_v39 = vshll.u32 %v181_v20, 16  ;;  %v1559_v42 = vld [vmem:[%s2159_s1 + $0xc] sm:$0x3]  ;;  %v1525_v43 = vcombine.low %v1982_v24, %v1998_v36  ;;  %v504_v44 = vrot.slane %v502_v18, 4  ;;  %v507_v45 = vrot.slane %v505_v19, 5 }
  0x21   : > { %v511_v46 = vshll.u32 %v183_v28, 16  ;;  %v494_v48 = vor.u32 %v493_v38, %v490_v37  ;;  %v518_v50 = vrot.slane %v516_v31, 4  ;;  %v521_v51 = vrot.slane %v519_v32, 5  ;;  %v203_v6 = vld [vmem:[%s1869_s25 + $0xa0] sm:$0xf] }
  0x22   : > { %v499_v49 = vrot.slane %v497_v39, 5  ;;  %1697 = vmatmul.mubr.msk.bf16.vlgmr.msra.gmra.mxu0 %vm246_vm1, %v1525_v43  ;;  %v508_v53 = vor.u32 %v507_v45, %v504_v44  ;;  %v525_v55 = vshll.u32 %v185_v30, 16  ;;  %v532_v56 = vrot.slane %v530_v7, 4  ;;  %v205_v8 = vld [vmem:[%s1869_s25 + $0xa8] sm:$0xf] }
  0x23   : > { %v513_v54 = vrot.slane %v511_v46, 5  ;;  %1715 = vmatpush3.bf16.msra.mxu0 %v1928_v35  ;;  %v495_v57 = vrot.slane %v494_v48, 4  ;;  %v522_v58 = vor.u32 %v521_v51, %v518_v50  ;;  %v535_v59 = vrot.slane %v533_v33, 5  ;;  %v1799_v31 = vld [vmem:[%s1869_s25 + $0xd8] ss:$8 sps:$4 sm:$0xff]  }
  0x24   : > { %v539_v60 = vshll.u32 %v187_v34, 16  ;;  %1691 = vmatmul.mubr.msk.bf16.gmra.mxu1 %vm246_vm1, %v1518_v27  ;;  %v509_v61 = vrot.slane %v508_v53, 4  ;;  %v527_v63 = vrot.slane %v525_v55, 5  ;;  %v1533_v0 = vcombine.low %v199_v40, %v201_v41  ;;  %1773 = vmatprep.subr.msk.bf16.mxu0 %vm259_vm0, %v1559_v42  ;;  %v207_v32 = vld [vmem:[%s1869_s25 + $0xb0] sm:$0xf] }
  0x25   : > { %v866_v1 = vshrl.u32 %v199_v40, 16  ;;  %v2013_v2 = vsel %vm1942_vm4, %v495_v57, %v499_v49  ;;  %v523_v35 = vrot.slane %v522_v58, 4  ;;  %v536_v4 = vor.u32 %v535_v59, %v532_v56  ;;  %v209_v37 = vld [vmem:[%s1869_s25 + $0xb8] sm:$0xf]  ;;  %v211_v44 = vld [vmem:[%s1869_s25 + $0xc0] sm:$0xf] }
  0x26   : > { %v541_v5 = vrot.slane %v539_v60, 5  ;;  %v2019_v18 = vsel %vm1942_vm4, %v509_v61, %v513_v54  ;;  %1706 = vmatprep.mubr.msk.bf16.mxu1 %vm246_vm1, %v1533_v0  ;;  %v869_v20 = vshll.u32 %v199_v40, 16  ;;  %v2025_v23 = vsel %vm259_vm0, %v1559_v42, 0  ;;  %v213_v45 = vld [vmem:[%s1869_s25 + $0xc8] sm:$0xf] }
  0x27   : > { %v2022_v19 = vrot.slane %v866_v1, 4  ;;  %v1526_v26 = vcombine.low %v2013_v2, %v2019_v18  ;;  %v2031_v27 = vsel %vm1942_vm4, %v523_v35, %v527_v63  ;;  %v537_v28 = vrot.slane %v536_v4, 4  ;;  %v200_v1 = vld [vmem:[%s1869_s25 + $0x94] sm:$0x1]  ;;  %v1800_v35 = vld [vmem:[%s1869_s25 + $0xe8] ss:$8 sps:$4 sm:$0xff]  }
  0x28   : > { %v880_v30 = vshrl.u32 %v201_v41, 16  ;;  %v883_v7 = vshll.u32 %v201_v41, 16  ;;  %v1534_v33 = vcombine.low %v203_v6, %v205_v8  ;;  %v894_v34 = vshrl.u32 %v203_v6, 16  ;;  %v2048_v41 = vld [vmem:[%s2159_s1 + $0xe] sm:$0x3] }
  0x29   : > { %v1560_v38 = vcombine.low %v1910_v22, %v1913_v25  ;;  %1700 = vmatprep.mubr.msk.bf16.mxu0 %vm246_vm1, %v1526_v26  ;;  %v2041_v39 = vsel %vm1942_vm4, %v537_v28, %v541_v5  ;;  %v871_v40 = vrot.slane %v869_v20, 5  ;;  %v897_v42 = vshll.u32 %v203_v6, 16  ;;  %v202_v20 = vld [vmem:[%s1869_s25 + $0x9c] sm:$0x1] }
  0x2a   : > { %v908_v43 = vshrl.u32 %v205_v8, 16  ;;  %v1527_v46 = vcombine.low %v2031_v27, %v2041_v39  ;;  %v882_v48 = vrot.slane %v880_v30, 4  ;;  %v885_v49 = vrot.slane %v883_v7, 5 }
  0x2b   : > { %v911_v50 = vshll.u32 %v205_v8, 16  ;;  %v896_v51 = vrot.slane %v894_v34, 4  ;;  %v899_v53 = vrot.slane %v897_v42, 5  ;;  %v1535_v54 = vcombine.low %v207_v32, %v209_v37 }
  0x2c   : > { %v922_v55 = vshrl.u32 %v207_v32, 16  ;;  %1701 = vmatmul.mubr.msk.bf16.gmra.mxu0 %vm246_vm1, %v1527_v46  ;;  %1707 = vmatmul.mubr.msk.bf16.vlgmr.msra.gmra.mxu1 %vm246_vm1, %v1534_v33  ;;  %v910_v56 = vrot.slane %v908_v43, 4  ;;  %v925_v57 = vshll.u32 %v207_v32, 16  ;;  %v936_v58 = vshrl.u32 %v209_v37, 16  ;;  %v1803_v43 = vld [vmem:[%s1869_s25 + $0xf8] ss:$8 sps:$4 sm:$0xff]  }
  0x2d   : > { %v939_v59 = vshll.u32 %v209_v37, 16  ;;  %v913_v60 = vrot.slane %v911_v50, 5  ;;  %1716 = vmatprep.mubr.msk.bf16.mxu0 %vm246_vm1, %v1799_v31  ;;  %1725 = vmatpush3.bf16.msra.mxu1 %v1976_v21  ;;  %v950_v63 = vshrl.u32 %v211_v44, 16  ;;  %v953_v0 = vshll.u32 %v211_v44, 16  ;;  %v204_v31 = vld [vmem:[%s1869_s25 + $0xa4] sm:$0x1] }
  0x2e   : > { %v924_v61 = vrot.slane %v922_v55, 4  ;;  %1710 = vmatprep.mubr.msk.bf16.mxu1 %vm246_vm1, %v1535_v54  ;;  %v927_v4 = vrot.slane %v925_v57, 5  ;;  %v938_v5 = vrot.slane %v936_v58, 4  ;;  %v1536_v6 = vcombine.low %v211_v44, %v213_v45  ;;  %1774 = vmatprep.subr.msk.bf16.mxu1 %vm259_vm0, %v2048_v41  ;;  %v206_v37 = vld [vmem:[%s1869_s25 + $0xac] sm:$0x1] }
  0x2f   : > { %v964_v8 = vshrl.u32 %v213_v45, 16  ;;  %v941_v26 = vrot.slane %v939_v59, 5  ;;  %v952_v21 = vrot.slane %v950_v63, 4  ;;  %v967_v28 = vshll.u32 %v213_v45, 16  ;;  %v1577_v54 = vld [vmem:[%s2159_s1 + $0x10] sm:$0x3] }
  0x30   : > { %v872_v30 = vor.u32 %v871_v40, %v2022_v19  ;;  %v955_v32 = vrot.slane %v953_v0, 5  ;;  %v875_v7 = vshll.u32 %v200_v1, 16  ;;  %v886_v33 = vor.u32 %v885_v49, %v882_v48  ;;  %v208_v57 = vld [vmem:[%s1869_s25 + $0xb4] sm:$0x1]  ;;  %v210_v63 = vld [vmem:[%s1869_s25 + $0xbc] sm:$0x1] }
  0x31   : > { %v889_v34 = vshll.u32 %v202_v20, 16  ;;  %v966_v42 = vrot.slane %v964_v8, 4  ;;  %v900_v46 = vor.u32 %v899_v53, %v896_v51  ;;  %v903_v50 = vshll.u32 %v204_v31, 16  ;;  %v214_v31 = vld [vmem:[%s1869_s25 + $0xcc] sm:$0x1] }
  0x32   : > { %v873_v44 = vrot.slane %v872_v30, 4  ;;  %v877_v45 = vrot.slane %v875_v7, 5  ;;  %v887_v19 = vrot.slane %v886_v33, 4  ;;  %v914_v55 = vor.u32 %v913_v60, %v910_v56  ;;  %v212_v56 = vld [vmem:[%s1869_s25 + $0xc4] sm:$0x1] }
  0x33   : > { %v891_v40 = vrot.slane %v889_v34, 5  ;;  %v969_v58 = vrot.slane %v967_v28, 5  ;;  %v901_v48 = vrot.slane %v900_v46, 4  ;;  %v905_v49 = vrot.slane %v903_v50, 5  ;;  %v1804_v34 = vld [vmem:[%s1869_s25 + $0x108] ss:$8 sps:$4 sm:$0xff]  }
  0x34   : > { %v917_v59 = vshll.u32 %v206_v37, 16  ;;  %1717 = vmatmul.mubr.msk.bf16.vlgmr.msra.gmra.mxu0 %vm246_vm1, %v1800_v35  ;;  %1711 = vmatmul.mubr.msk.bf16.gmra.mxu1 %vm246_vm1, %v1536_v6  ;;  %v878_v51 = vsel %vm1942_vm4, %v873_v44, %v877_v45  ;;  %v915_v0 = vrot.slane %v914_v55, 4  ;;  %v928_v1 = vor.u32 %v927_v4, %v924_v61 }
  0x35   : > { %v892_v53 = vsel %vm1942_vm4, %v887_v19, %v891_v40  ;;  %1735 = vmatpush3.bf16.msra.mxu0 %v2025_v23  ;;  %1720 = vmatprep.mubr.msk.bf16.mxu0 %vm246_vm1, %v1803_v43  ;;  %v906_v35 = vsel %vm1942_vm4, %v901_v48, %v905_v49  ;;  %v931_v8 = vshll.u32 %v208_v57, 16  ;;  %v942_v28 = vor.u32 %v941_v26, %v938_v5 }
  0x36   : > { %v1551_v60 = vcombine.low %v878_v51, %v892_v53  ;;  %v919_v6 = vrot.slane %v917_v59, 5  ;;  %1775 = vmatprep.subr.msk.bf16.mxu0 %vm259_vm0, %v1577_v54  ;;  %v929_v20 = vrot.slane %v928_v1, 4  ;;  %v945_v30 = vshll.u32 %v210_v63, 16  ;;  %v189_v59 = vld [vmem:[%s1869_s25 + $0x44] sm:$0x1] }
  0x37   : > { %v956_v61 = vor.u32 %v955_v32, %v952_v21  ;;  %v933_v4 = vrot.slane %v931_v8, 5  ;;  %v959_v7 = vshll.u32 %v212_v56, 16  ;;  %v970_v33 = vor.u32 %v969_v58, %v966_v42  ;;  %v198_v21 = vld [vmem:[%s1869_s25 + $0x88] sm:$0xf] }
  0x38   : > { %1726 = vmatprep.mubr.msk.bf16.mxu1 %vm246_vm1, %v1551_v60  ;;  %v920_v23 = vsel %vm1942_vm4, %v915_v0, %v919_v6  ;;  %v943_v43 = vrot.slane %v942_v28, 4  ;;  %v947_v44 = vrot.slane %v945_v30, 5  ;;  %v973_v45 = vshll.u32 %v214_v31, 16 }
  0x39   : > { %v1552_v37 = vcombine.low %v906_v35, %v920_v23  ;;  %v957_v46 = vrot.slane %v956_v61, 4  ;;  %v934_v5 = vsel %vm1942_vm4, %v929_v20, %v933_v4  ;;  %v961_v26 = vrot.slane %v959_v7, 5 }
  0x3a   : > { %v971_v50 = vrot.slane %v970_v33, 4  ;;  %v1196_v32 = vsel %vm259_vm0, %v2048_v41, 0  ;;  %v948_v19 = vsel %vm1942_vm4, %v943_v43, %v947_v44  ;;  %v975_v42 = vrot.slane %v973_v45, 5 }
  0x3b   : > { %v1553_v40 = vcombine.low %v934_v5, %v948_v19  ;;  %v1572_v55 = vcombine.low %v1899_v17, %v198_v21  ;;  %v962_v41 = vsel %vm1942_vm4, %v957_v46, %v961_v26  ;;  %v1561_v58 = vcombine.low %v1921_v29, %v1947_v52 }
  0x3c   : > { %1721 = vmatmul.mubr.msk.bf16.gmra.mxu0 %vm246_vm1, %v1804_v34  ;;  %1727 = vmatmul.mubr.msk.bf16.vlgmr.msra.gmra.mxu1 %vm246_vm1, %v1552_v37  ;;  %v976_v57 = vsel %vm1942_vm4, %v971_v50, %v975_v42  ;;  %v1562_v17 = vcombine.low %v1953_v62, %v1961_v3  ;;  %v1569_v22 = vcombine.low %v1877_v9, %v1880_v10  ;;  %v1305_v25 = vsel %vm259_vm0, %v1577_v54, 0 }
  0x3d   : > { %1736 = vmatprep.mubr.msk.bf16.mxu0 %vm246_vm1, %v1560_v38  ;;  %1745 = vmatpush3.bf16.msra.mxu1 %v1196_v32  ;;  %v1554_v48 = vcombine.low %v962_v41, %v976_v57  ;;  %v188_v38 = vld [vmem:[%s1869_s25 + $0x40] sm:$0xf]  ;;  %v1570_v52 = vcombine.low %v1887_v13, %v1890_v14  ;;  %v1571_v10 = vcombine.low %v1893_v15, %v1896_v16  ;;  %v1281_v14 = vshll.u32 %v189_v59, 16 }
  0x3e   : > { %1730 = vmatprep.mubr.msk.bf16.mxu1 %vm246_vm1, %v1553_v40  ;;  %v1272_v49 = vshrl.u32 %v188_v38, 16  ;;  %v1275_v29 = vshll.u32 %v188_v38, 16  ;;  %v1563_v9 = vcombine.low %v1965_v11, %v188_v38  ;;  %v1578_v54 = vcombine.low %v1970_v12, %v1982_v24 }
  0x3f   : > { %v1579_v11 = vcombine.low %v1998_v36, %v2013_v2  ;;  %v1580_v15 = vcombine.low %v2019_v18, %v2031_v27  ;;  %v1283_v63 = vrot.slane %v1281_v14, 5 }
  0x40   : > { %v1274_v62 = vrot.slane %v1272_v49, 4  ;;  %v1277_v3 = vrot.slane %v1275_v29, 5 }
  0x42   : > { %v1278_v13 = vor.u32 %v1277_v3, %v1274_v62 }
  0x44   : > { %1737 = vmatmul.mubr.msk.bf16.vlgmr.msra.gmra.mxu0 %vm246_vm1, %v1561_v58  ;;  %1731 = vmatmul.mubr.msk.bf16.gmra.mxu1 %vm246_vm1, %v1554_v48  ;;  %v1279_v16 = vrot.slane %v1278_v13, 4 }
  0x45   : > { %1755 = vmatpush3.bf16.msra.mxu0 %v1305_v25  ;;  %1740 = vmatprep.mubr.msk.bf16.mxu0 %vm246_vm1, %v1562_v17 }
  0x46   : > { %1746 = vmatprep.mubr.msk.bf16.mxu1 %vm246_vm1, %v1569_v22  ;;  %v1284_v12 = vsel %vm1942_vm4, %v1279_v16, %v1283_v63 }
  0x47   : > { %v1581_v24 = vcombine.low %v2041_v39, %v1284_v12 }
  0x4c   : > { %1741 = vmatmul.mubr.msk.bf16.gmra.mxu0 %vm246_vm1, %v1563_v9  ;;  %1747 = vmatmul.mubr.msk.bf16.vlgmr.msra.gmra.mxu1 %vm246_vm1, %v1570_v52 }
  0x4d   : > { %1756 = vmatprep.mubr.msk.bf16.mxu0 %vm246_vm1, %v1578_v54  ;;  %1750 = vmatprep.mubr.msk.bf16.mxu1 %vm246_vm1, %v1571_v10 }
  0x54   : > { %1757 = vmatmul.mubr.msk.bf16.vlgmr.msra.gmra.mxu0 %vm246_vm1, %v1579_v11  ;;  %1751 = vmatmul.mubr.msk.bf16.gmra.mxu1 %vm246_vm1, %v1572_v55 }
  0x55   : > { %1760 = vmatprep.mubr.msk.bf16.mxu0 %vm246_vm1, %v1580_v15 }
  0x5c   : > { %1761 = vmatmul.mubr.msk.bf16.gmra.mxu0 %vm246_vm1, %v1581_v24 }
  0xd3   : > { %v1678_v51 = vpop.f32.mrf.mxu0 }
  0xd4   : > { %v1682_v36 = vpop.f32.mrf.mxu1 }
  0xd5   : > { %v297_v2 = vpop.f32.mrf.mxu0 }
  0xd6   : > { %v313_v53 = vpop.f32.mrf.mxu1 }
  0xd7   : > { %v1679_v27 = vpop.f32.mrf.mxu0 }
  0xd8   : > { %v1683_v18 = vpop.f32.mrf.mxu1 }
  0xd9   : > { %v300_v56 = vpop.f32.mrf.mxu0 }
  0xda   : > { %v2142_v0 = vpop.f32.mrf.mxu1 }
  0xdc   : > { %v1688_v1 = vpop.f32.mrf.mxu1 }
  0xdd   : > { %v406_v57 = vadd.f32 %v1688_v1, %v1678_v51 }
  0xde   : > { %v397_v60 = vpop.f32.mrf.mxu1 }
  0xdf   : > { %v398_v17 = vadd.f32 %v397_v60, %v297_v2 }
  0xe0   : > { %v1689_v35 = vpop.f32.mrf.mxu1 }
  0xe1   : > { %v409_v49 = vadd.f32 %v1689_v35, %v1679_v27 }
  0xe2   : > { %v1698_v6 = vpop.f32.mrf.mxu0  ;;  %v400_v8 = vpop.f32.mrf.mxu1 }
  0xe3   : > { %v639_v38 = vadd.f32 %v1698_v6, %v406_v57  ;;  %v401_v10 = vadd.f32 %v400_v8, %v300_v56 }
  0xe4   : > { %v606_v47 = vpop.f32.mrf.mxu0  ;;  %v1692_v20 = vpop.f32.mrf.mxu1 }
  0xe5   : > { %v637_v9 = vadd.f32 %v606_v47, %v398_v17  ;;  %v422_v13 = vadd.f32 %v1692_v20, %v1682_v36 }
  0xe6   : > { %v1699_v28 = vpop.f32.mrf.mxu0  ;;  %v413_v39 = vpop.f32.mrf.mxu1 }
  0xe7   : > { %v640_v59 = vadd.f32 %v1699_v28, %v409_v49  ;;  %v414_v63 = vadd.f32 %v413_v39, %v313_v53 }
  0xe8   : > { %v609_v30 = vpop.f32.mrf.mxu0  ;;  %v1693_v31 = vpop.f32.mrf.mxu1 }
  0xe9   : > { %v638_v16 = vadd.f32 %v609_v30, %v401_v10  ;;  %v425_v51 = vadd.f32 %v1693_v31, %v1683_v18 }
  0xea   : > { %v416_v61 = vpop.f32.mrf.mxu1 }
  0xeb   : > { %v417_v56 = vadd.f32 %v416_v61, %v2142_v0 }
  0xec   : > { %v1702_v23 = vpop.f32.mrf.mxu0  ;;  %v1708_v4 = vpop.f32.mrf.mxu1 }
  0xed   : > { %v749_v62 = vadd.f32 %v1708_v4, %v639_v38  ;;  %v643_v27 = vadd.f32 %v1702_v23, %v422_v13 }
  0xee   : > { %v622_v7 = vpop.f32.mrf.mxu0  ;;  %v716_v33 = vpop.f32.mrf.mxu1 }
  0xef   : > { %v747_v14 = vadd.f32 %v716_v33, %v637_v9  ;;  %v641_v28 = vadd.f32 %v622_v7, %v414_v63 }
  0xf0   : > { %v1703_v34 = vpop.f32.mrf.mxu0  ;;  %v1709_v37 = vpop.f32.mrf.mxu1 }
  0xf1   : > { %v750_v24 = vadd.f32 %v1709_v37, %v640_v59  ;;  %v644_v33 = vadd.f32 %v1703_v34, %v425_v51 }
  0xf2   : > { %v625_v43 = vpop.f32.mrf.mxu0  ;;  %v719_v44 = vpop.f32.mrf.mxu1 }
  0xf3   : > { %v748_v35 = vadd.f32 %v719_v44, %v638_v16 }
  0xf4   : > { %v1718_v46 = vpop.f32.mrf.mxu0  ;;  %v1712_v5 = vpop.f32.mrf.mxu1 }
  0xf5   : > { %v859_v12 = vadd.f32 %v1718_v46, %v749_v62  ;;  %v753_v20 = vadd.f32 %v1712_v5, %v643_v27  ;;  %v642_v46 = vadd.f32 %v625_v43, %v417_v56 }
  0xf6   : > { %v826_v26 = vpop.f32.mrf.mxu0  ;;  %v732_v50 = vpop.f32.mrf.mxu1 }
  0xf7   : > { %v857_v60 = vadd.f32 %v826_v26, %v747_v14  ;;  %v751_v37 = vadd.f32 %v732_v50, %v641_v28 }
  0xf8   : > { %v1719_v45 = vpop.f32.mrf.mxu0  ;;  %v1713_v21 = vpop.f32.mrf.mxu1 }
  0xf9   : > { %v860_v36 = vadd.f32 %v1719_v45, %v750_v24  ;;  %v754_v23 = vadd.f32 %v1713_v21, %v644_v33  ;;  %v1586_v21 = vld [vmem:[%s2160_s2] ss:$0 sm:$0xff] }
  0xfa   : > { %v829_v32 = vpop.f32.mrf.mxu0  ;;  %v735_v19 = vpop.f32.mrf.mxu1 }
  0xfb   : > { %v858_v39 = vadd.f32 %v829_v32, %v748_v35  ;;  %v752_v17 = vadd.f32 %v735_v19, %v642_v46 }
  0xfc   : > { %v1722_v40 = vpop.f32.mrf.mxu0  ;;  %v1728_v42 = vpop.f32.mrf.mxu1 }
  0xfd   : > { %v1073_v6 = vadd.f32 %v1728_v42, %v859_v12  ;;  %v863_v42 = vadd.f32 %v1722_v40, %v753_v20 }
  0xfe   : > { %v842_v55 = vpop.f32.mrf.mxu0  ;;  %v1040_v41 = vpop.f32.mrf.mxu1 }
  0xff   : > { %v1071_v4 = vadd.f32 %v1040_v41, %v857_v60  ;;  %v861_v5 = vadd.f32 %v842_v55, %v751_v37 }
 0x100   : > { %v1723_v58 = vpop.f32.mrf.mxu0  ;;  %v1729_v48 = vpop.f32.mrf.mxu1 }
 0x101   : > { %v1074_v31 = vadd.f32 %v1729_v48, %v860_v36  ;;  %v864_v49 = vadd.f32 %v1723_v58, %v754_v23 }
 0x102   : > { %v2144_v22 = vpop.f32.mrf.mxu0  ;;  %v1043_v25 = vpop.f32.mrf.mxu1 }
 0x103   : > { %v1072_v0 = vadd.f32 %v1043_v25, %v858_v39  ;;  %v862_v25 = vadd.f32 %v2144_v22, %v752_v17 }
 0x104   : > { %v1738_v29 = vpop.f32.mrf.mxu0  ;;  %v1732_v52 = vpop.f32.mrf.mxu1 }
 0x105   : > { %v1169_v18 = vadd.f32 %v1738_v29, %v1073_v6  ;;  %v1077_v34 = vadd.f32 %v1732_v52, %v863_v42 }
 0x106   : > { %v1136_v3 = vpop.f32.mrf.mxu0  ;;  %v1056_v54 = vpop.f32.mrf.mxu1 }
 0x107   : > { %v1167_v57 = vadd.f32 %v1136_v3, %v1071_v4  ;;  %v1075_v48 = vadd.f32 %v1056_v54, %v861_v5 }
 0x108   : > { %v1739_v11 = vpop.f32.mrf.mxu0  ;;  %v1733_v15 = vpop.f32.mrf.mxu1 }
 0x109   : > { %v1170_v41 = vadd.f32 %v1739_v11, %v1074_v31  ;;  %v1078_v10 = vadd.f32 %v1733_v15, %v864_v49 }
 0x10a   : > { %v1139_v2 = vpop.f32.mrf.mxu0  ;;  %v1059_v1 = vpop.f32.mrf.mxu1 }
 0x10b   : > { %v1168_v29 = vadd.f32 %v1139_v2, %v1072_v0  ;;  %v1076_v58 = vadd.f32 %v1059_v1, %v862_v25 }
 0x10c   : > { %v1742_v8 = vpop.f32.mrf.mxu0  ;;  %v1748_v47 = vpop.f32.mrf.mxu1 }
 0x10d   : > { %v1265_v61 = vadd.f32 %v1748_v47, %v1169_v18  ;;  %v1173_v55 = vadd.f32 %v1742_v8, %v1077_v34 }
 0x10e   : > { %v1152_v30 = vpop.f32.mrf.mxu0  ;;  %v1232_v53 = vpop.f32.mrf.mxu1 }
 0x10f   : > { %v1263_v38 = vadd.f32 %v1232_v53, %v1167_v57  ;;  %v1171_v54 = vadd.f32 %v1152_v30, %v1075_v48 }
 0x110   : > { %v1743_v26 = vpop.f32.mrf.mxu0  ;;  %v1749_v44 = vpop.f32.mrf.mxu1 }
 0x111   : > { %v1266_v40 = vadd.f32 %v1749_v44, %v1170_v41  ;;  %v1174_v12 = vadd.f32 %v1743_v26, %v1078_v10 }
 0x112   : > { %v1155_v7 = vpop.f32.mrf.mxu0  ;;  %v1235_v45 = vpop.f32.mrf.mxu1 }
 0x113   : > { %v1264_v62 = vadd.f32 %v1235_v45, %v1168_v29  ;;  %v1172_v2 = vadd.f32 %v1155_v7, %v1076_v58 }
 0x114   : > { %v1758_v32 = vpop.f32.mrf.mxu0  ;;  %v1752_v50 = vpop.f32.mrf.mxu1 }
 0x115   : > { %v1374_v43 = vadd.f32 %v1758_v32, %v1265_v61  ;;  %v1269_v11 = vadd.f32 %v1752_v50, %v1173_v55 }
 0x116   : > { %v1341_v19 = vpop.f32.mrf.mxu0  ;;  %v1248_v9 = vpop.f32.mrf.mxu1 }
 0x117   : > { %v1372_v52 = vadd.f32 %v1341_v19, %v1263_v38  ;;  %v1389_v3 = vadd.f32 %v1586_v21, %v1374_v43  ;;  %v1267_v51 = vadd.f32 %v1248_v9, %v1171_v54 }
 0x118   : > { %v1759_v59 = vpop.f32.mrf.mxu0  ;;  %v1753_v13 = vpop.f32.mrf.mxu1 }
 0x119   : > { %v1375_v14 = vadd.f32 %v1759_v59, %v1266_v40  ;;  %v1387_v16 = vadd.f32 %v1586_v21, %v1372_v52  ;;  %v1397_v27 = vmax.f32 %v1389_v3, 0.0  ;;  %v1270_v56 = vadd.f32 %v1753_v13, %v1174_v12 }
 0x11a   : > { %v1344_v63 = vpop.f32.mrf.mxu0  ;;  %v1251_v15 = vpop.f32.mrf.mxu1 }
 0x11b   : > { %v1390_v24 = vadd.f32 %v1586_v21, %v1375_v14  ;;  %v1373_v22 = vadd.f32 %v1344_v63, %v1264_v62  ;;  %v1395_v8 = vmax.f32 %v1387_v16, 0.0  ;;  %v1268_v4 = vadd.f32 %v1251_v15, %v1172_v2 }
 0x11c   : > { %v1762_v60 = vpop.f32.mrf.mxu0 }
 0x11d   : > { %v1398_v35 = vmax.f32 %v1390_v24, 0.0  ;;  %v1388_v6 = vadd.f32 %v1586_v21, %v1373_v22  ;;  %v1378_v1 = vadd.f32 %v1762_v60, %v1269_v11 }
 0x11e   : > { %v1357_v47 = vpop.f32.mrf.mxu0 }
 0x11f   : > { %v1614_v28 = vpack.c.bf16 %v1398_v35, %v1397_v27  ;;  %v1396_v36 = vmax.f32 %v1388_v6, 0.0  ;;  %v1376_v20 = vadd.f32 %v1357_v47, %v1267_v51  ;;  %v1393_v53 = vadd.f32 %v1586_v21, %v1378_v1 }
 0x120   : > { %v1763_v33 = vpop.f32.mrf.mxu0 }
 0x121   : > { %1626 = vst [vmem:[%s170_s16 + $0x8] sm:$0xff] %v1614_v28   ;;  %v1609_v30 = vpack.c.bf16 %v1396_v36, %v1395_v8  ;;  %v1379_v39 = vadd.f32 %v1763_v33, %v1270_v56  ;;  %v1391_v18 = vadd.f32 %v1586_v21, %v1376_v20  ;;  %v1401_v23 = vmax.f32 %v1393_v53, 0.0 }
 0x122   : > { %v1360_v37 = vpop.f32.mrf.mxu0 }
 0x123   : > { %1610 = vst [vmem:[%s170_s16] sm:$0xff] %v1609_v30   ;;  %v1394_v31 = vadd.f32 %v1586_v21, %v1379_v39  ;;  %v1377_v46 = vadd.f32 %v1360_v37, %v1268_v4  ;;  %v1399_v42 = vmax.f32 %v1391_v18, 0.0 }
 0x125   : > { %v1402_v26 = vmax.f32 %v1394_v31, 0.0  ;;  %v1392_v44 = vadd.f32 %v1586_v21, %v1377_v46 }
 0x127   : > { %v1624_v57 = vpack.c.bf16 %v1402_v26, %v1401_v23  ;;  %v1400_v0 = vmax.f32 %v1392_v44, 0.0 }
 0x129   : > { %1628 = vst [vmem:[%s170_s16 + $0x18] sm:$0xff] %v1624_v57   ;;  %v1619_v61 = vpack.c.bf16 %v1400_v0, %v1399_v42 }
 0x12b   : > { %1627 = vst [vmem:[%s170_s16 + $0x10] sm:$0xff] %v1619_v61  }
 0x12c PF: > { %s13_s12 = sadd.s32 1, %s1815_s12  }
 0x12d   : > { %p10_p4 = scmp.ge.s32.totalorder %s13_s12, 4  }
 0x12f   :  { %12 = sbr.rel (!%p10_p4) target bundleno = 1 (0x1), region = 70 }

// kernel: basic_block_forward.5
= control target key start
LH: loop header
LB: loop body
LE: loop exit
PB: predicated region body
PF: predicated region fallthrough
CT: control target
= control target key end

     0   :  { %s1678_s15 = smov 0   ;;  %s2129_s0 = inlined_call_operand.vmem [shape: bf16[2,10,10,8], index: 0, kind: input, shape index: {}]   ;;  %s2130_s1 = inlined_call_operand.vmem [shape: bf16[9,8,128], index: 1, kind: input, shape index: {}]   ;;  %s2131_s2 = inlined_call_operand.vmem [shape: f32[1,128], index: 2, kind: input, shape index: {}]   ;;  %s2132_s3 = inlined_call_operand.vmem [shape: f32[2,64,128], index: 3, kind: input, shape index: {}]   ;;  %s2133_s4 = inlined_call_operand.vmem [shape: f32[2,64,128], index: 4, kind: output, shape index: {}]  }
   0x1 LB: > { %s1384_s16 = sadd.s32 4294967295, %s1651_s15   ;;  %p1388_p0 = scmp.ge.s32.totalorder %s1651_s15, 1  ;;  %s1651_s15 = sphi %s1678_s15, %s14_s15  }
   0x2   : > { %p172_p1 = scmp.lt.s32.totalorder %s1651_s15, 3 }
   0x4   : > { %p173_p2 = pnand %p1388_p0, %p172_p1 }
   0x5   : > { %p203_p3 = scmp.lt.s32.totalorder (!%p173_p2), %s1384_s16, 1 }
   0x6   : > { %176 = sbr.rel (%p173_p2) target bundleno = 316 (0x13c), region = 36 }
   0xb   : > { %v1394_v0 = vld [vmem:[%s2130_s1 + $0x4] sm:$0xf]  ;;  %vm382_vm0 = vcmask 1043456   ;;  %v239_v2 = vld [vmem:[%s2130_s1] sm:$0xf]  ;;  %s2139_s16 = smov (!%p203_p3, %s1384_s16), 1 }
   0xc   : > { %1618 = vmatprep.subr.msk.bf16.mxu1 %vm382_vm0, %v1394_v0  ;;  %1617 = vmatprep.subr.msk.bf16.mxu0 %vm382_vm0, %v1394_v0  ;;  %v384_v1 = vsel %vm382_vm0, %v1394_v0, 0  ;;  %v1419_v3 = vld [vmem:[%s2130_s1 + $0x8] sm:$0xf]  ;;  %s1627_s23 = smul.u32 80, %s2139_s16  ;;  %vm240_vm1 = vsmask.f32 3328 }
   0xd   : > { %1616 = vmatpush3.bf16.msra.mxu1 %v384_v1  ;;  %1526 = vmatpush3.bf16.msra.mxu0 %v384_v1  ;;  %vm241_vm2 = vsmask.f32 7440  ;;  %vm369_vm3 = vcmask 64512   ;;  %v1752_v37 = vsel %vm382_vm0, %v239_v2, 0  ;;  %v1755_v38 = vsel %vm382_vm0, %v1419_v3, 0  ;;  %s1478_s13 = sshll.u32 %s2139_s16, 6 }
   0xe   : > { %1619 = vmatprep.subr.msk.bf16.mxu1 %vm382_vm0, %v239_v2  ;;  %1620 = vmatprep.subr.msk.bf16.mxu0 %vm382_vm0, %v1419_v3  ;;  %s1706_s26 = scalar_lea.vmem %s2129_s0, %s1627_s23  ;;  %vm1740_vm4 = vmor %vm240_vm1, %vm241_vm2  ;;  %vm559_vm5 = vcmask 1042432   ;;  %vm560_vm6 = vcmask 1046532   ;;  %s2079_s18 = scalar_lea.vmem %s2132_s3, %s1478_s13 }
   0xf   : > { %v1709_v4 = vld [vmem:[%s1706_s26] sm:$0xf]  ;;  %v1712_v5 = vld [vmem:[%s1706_s26 + $0x4] sm:$0x1]  ;;  %v1715_v6 = vld [vmem:[%s1706_s26 + $0x8] sm:$0xf]  ;;  %s2102_s23 = scalar_lea.vmem %s2133_s4, %s1478_s13 }
  0x10   : > { %v1718_v7 = vld [vmem:[%s1706_s26 + $0xc] sm:$0x1]  ;;  %v1721_v8 = vld [vmem:[%s1706_s26 + $0x10] sm:$0xf]  ;;  %v244_v9 = vshrl.u32 %v1709_v4, 16  ;;  %v247_v10 = vshll.u32 %v1709_v4, 16  ;;  %v1403_v54 = vcombine.low %v1709_v4, %v1715_v6  ;;  %vm1830_vm7 = vmor %vm559_vm5, %vm560_vm6 }
  0x11   : > { %v253_v11 = vshll.u32 %v1712_v5, 16  ;;  %v258_v12 = vshrl.u32 %v1715_v6, 16  ;;  %v1728_v13 = vld [vmem:[%s1706_s26 + $0x14] sm:$0x1]  ;;  %v261_v14 = vshll.u32 %v1715_v6, 16  ;;  %v267_v15 = vshll.u32 %v1718_v7, 16 }
  0x12   : > { %v272_v16 = vshrl.u32 %v1721_v8, 16  ;;  %v275_v17 = vshll.u32 %v1721_v8, 16  ;;  %v246_v18 = vrot.slane %v244_v9, 4  ;;  %v249_v19 = vrot.slane %v247_v10, 5  ;;  %v1735_v21 = vld [vmem:[%s1706_s26 + $0x18] sm:$0xf] }
  0x13   : > { %v260_v20 = vrot.slane %v258_v12, 4  ;;  %v263_v22 = vrot.slane %v261_v14, 5  ;;  %v255_v26 = vrot.slane %v253_v11, 5  ;;  %v281_v27 = vshll.u32 %v1728_v13, 16  ;;  %v1745_v32 = vld [vmem:[%s1706_s26 + $0x1c] sm:$0x1] }
  0x14   : > { %v274_v23 = vrot.slane %v272_v16, 4  ;;  %v277_v24 = vrot.slane %v275_v17, 5  ;;  %v250_v25 = vor.u32 %v249_v19, %v246_v18  ;;  %v269_v30 = vrot.slane %v267_v15, 5  ;;  %v1748_v33 = vld [vmem:[%s1706_s26 + $0x20] sm:$0xf] }
  0x15   : > { %v264_v29 = vor.u32 %v263_v22, %v260_v20  ;;  %v286_v34 = vshrl.u32 %v1735_v21, 16  ;;  %v283_v36 = vrot.slane %v281_v27, 5  ;;  %v1758_v41 = vld [vmem:[%s1706_s26 + $0x24] sm:$0x1]  ;;  %v289_v43 = vshll.u32 %v1735_v21, 16 }
  0x16   : > { %v278_v31 = vor.u32 %v277_v24, %v274_v23  ;;  %v251_v35 = vrot.slane %v250_v25, 4  ;;  %v1764_v45 = vld [vmem:[%s1706_s26 + $0x28] sm:$0xf]  ;;  %v295_v46 = vshll.u32 %v1745_v32, 16  ;;  %v300_v47 = vshrl.u32 %v1748_v33, 16 }
  0x17   : > { %v265_v39 = vrot.slane %v264_v29, 4  ;;  %v288_v42 = vrot.slane %v286_v34, 4  ;;  %v303_v48 = vshll.u32 %v1748_v33, 16  ;;  %v564_v50 = vrot.slane %v1712_v5, 5  ;;  %v1775_v51 = vld [vmem:[%s1706_s26 + $0x2c] sm:$0x1] }
  0x18   : > { %v279_v40 = vrot.slane %v278_v31, 4  ;;  %v256_v44 = vsel %vm1740_vm4, %v251_v35, %v255_v26  ;;  %v1778_v52 = vld [vmem:[%s1706_s26 + $0x30] sm:$0xf]  ;;  %v291_v53 = vrot.slane %v289_v43, 5  ;;  %v1788_v57 = vld [vmem:[%s1706_s26 + $0x34] sm:$0x1] }
  0x19   : > { %v1771_v49 = vsel %vm1740_vm4, %v265_v39, %v269_v30  ;;  %v302_v58 = vrot.slane %v300_v47, 4  ;;  %v309_v59 = vshll.u32 %v1758_v41, 16  ;;  %v297_v61 = vrot.slane %v295_v46, 5  ;;  %v1794_v0 = vld [vmem:[%s1706_s26 + $0x38] sm:$0xf] }
  0x1a   : > { %v1784_v55 = vsel %vm1740_vm4, %v279_v40, %v283_v36  ;;  %v1395_v56 = vcombine.low %v256_v44, %v1771_v49  ;;  %v292_v60 = vor.u32 %v291_v53, %v288_v42  ;;  %v305_v62 = vrot.slane %v303_v48, 5  ;;  %v1801_v10 = vld [vmem:[%s1706_s26 + $0x3c] sm:$0x1]  ;;  %v1437_v43 = vld [vmem:[%s2130_s1 + $0x10] sm:$0xf] }
  0x1b   : > { %v314_v63 = vshrl.u32 %v1764_v45, 16  ;;  %v317_v1 = vshll.u32 %v1764_v45, 16  ;;  %v323_v2 = vshll.u32 %v1775_v51, 16  ;;  %v328_v3 = vshrl.u32 %v1778_v52, 16 }
  0x1c   : > { %1527 = vmatprep.mubr.msk.bf16.mxu0 %vm369_vm3, %v1395_v56  ;;  %v331_v9 = vshll.u32 %v1778_v52, 16  ;;  %v293_v11 = vrot.slane %v292_v60, 4  ;;  %v306_v12 = vor.u32 %v305_v62, %v302_v58  ;;  %v337_v15 = vshll.u32 %v1788_v57, 16 }
  0x1d   : > { %v316_v14 = vrot.slane %v314_v63, 4  ;;  %v311_v16 = vrot.slane %v309_v59, 5  ;;  %v319_v17 = vrot.slane %v317_v1, 5  ;;  %v330_v18 = vrot.slane %v328_v3, 4 }
  0x1e   : > { %v333_v19 = vrot.slane %v331_v9, 5  ;;  %v1806_v20 = vsel %vm1740_vm4, %v293_v11, %v297_v61  ;;  %v307_v22 = vrot.slane %v306_v12, 4  ;;  %v325_v23 = vrot.slane %v323_v2, 5 }
  0x1f   : > { %v342_v24 = vshrl.u32 %v1794_v0, 16  ;;  %v320_v25 = vor.u32 %v319_v17, %v316_v14  ;;  %v345_v27 = vshll.u32 %v1794_v0, 16  ;;  %v351_v29 = vshll.u32 %v1801_v10, 16  ;;  %v1428_v17 = vld [vmem:[%s2130_s1 + $0xc] sm:$0xf] }
  0x20   : > { %v334_v26 = vor.u32 %v333_v19, %v330_v18  ;;  %v568_v30 = vrot.slane %v1718_v7, 5  ;;  %v339_v31 = vrot.slane %v337_v15, 5  ;;  %v1814_v35 = vcombine.low %v1784_v55, %v1806_v20 }
  0x21   : > { %v344_v34 = vrot.slane %v342_v24, 4  ;;  %v1818_v36 = vsel %vm1740_vm4, %v307_v22, %v311_v16  ;;  %v321_v39 = vrot.slane %v320_v25, 4  ;;  %v347_v42 = vrot.slane %v345_v27, 5  ;;  %v1897_v16 = vld [vmem:[%s1706_s26 + $0x40] sm:$0xf] }
  0x22   : > { %v335_v40 = vrot.slane %v334_v26, 4  ;;  %v572_v44 = vrot.slane %v1728_v13, 5  ;;  %v353_v7 = vrot.slane %v351_v29, 5  ;;  %v576_v46 = vrot.slane %v1745_v32, 5  ;;  %1528 = vmatmul.mubr.msk.bf16.vlgmr.msra.gmra.mxu0 %vm369_vm3, %v1814_v35  ;;  %v1456_v24 = vld [vmem:[%s2130_s1 + $0x18] sm:$0xf] }
  0x23   : > { %v580_v47 = vrot.slane %v1758_v41, 5  ;;  %v1836_v53 = vsel %vm1740_vm4, %v321_v39, %v325_v23  ;;  %v348_v56 = vor.u32 %v347_v42, %v344_v34  ;;  %v584_v13 = vrot.slane %v1775_v51, 5  ;;  %1546 = vmatpush3.bf16.msra.mxu0 %v1755_v38 }
  0x24   : > { %v1411_v32 = vrot.slane %v1709_v4, 9  ;;  %v1843_v41 = vsel %vm1740_vm4, %v335_v40, %v339_v31  ;;  %v1847_v58 = vcombine.low %v1818_v36, %v1836_v53  ;;  %v1412_v59 = vrot.slane %v1715_v6, 9  ;;  %1622 = vmatprep.subr.msk.bf16.mxu0 %vm382_vm0, %v1437_v43  ;;  %v1940_v4 = vld [vmem:[%s1706_s26 + $0x48] sm:$0xf] }
  0x25   : > { %v1413_v60 = vrot.slane %v1721_v8, 9  ;;  %v349_v61 = vrot.slane %v348_v56, 4  ;;  %v1414_v51 = vrot.slane %v1735_v21, 9  ;;  %v1415_v62 = vrot.slane %v1748_v33, 9 }
  0x26   : > { %v565_v38 = vsel %vm1830_vm7, %v1411_v32, %v564_v50  ;;  %1531 = vmatprep.mubr.msk.bf16.mxu1 %vm369_vm3, %v1847_v58  ;;  %v588_v63 = vrot.slane %v1788_v57, 5  ;;  %v1863_v1 = vsel %vm1830_vm7, %v1412_v59, %v568_v30  ;;  %v1416_v50 = vrot.slane %v1764_v45, 9 }
  0x27   : > { %v1867_v5 = vsel %vm1830_vm7, %v1413_v60, %v572_v44  ;;  %v1872_v2 = vsel %vm1740_vm4, %v349_v61, %v353_v7  ;;  %v1420_v3 = vcombine.low %v565_v38, %v1863_v1  ;;  %v1877_v9 = vsel %vm1830_vm7, %v1414_v51, %v576_v46  ;;  %v236_v7 = vld [vmem:[%s1706_s26 + $0x44] sm:$0x1] }
  0x28   : > { %v1881_v57 = vsel %vm1830_vm7, %v1415_v62, %v580_v47  ;;  %v1885_v11 = vcombine.low %v1843_v41, %v1872_v2  ;;  %v1889_v12 = vcombine.low %v1867_v5, %v1877_v9  ;;  %v826_v14 = vsel %vm382_vm0, %v1437_v43, 0  ;;  %v1447_v47 = vld [vmem:[%s2130_s1 + $0x14] sm:$0xf] }
  0x29   : > { %v1894_v15 = vsel %vm1830_vm7, %v1416_v50, %v584_v13  ;;  %1547 = vmatprep.mubr.msk.bf16.mxu0 %vm369_vm3, %v1420_v3  ;;  %v1417_v19 = vrot.slane %v1778_v52, 9  ;;  %v1418_v22 = vrot.slane %v1794_v0, 9  ;;  %v592_v23 = vrot.slane %v1801_v10, 5 }
  0x2a   : > { %v1905_v18 = vcombine.low %v1881_v57, %v1894_v15  ;;  %1532 = vmatmul.mubr.msk.bf16.vlgmr.msra.gmra.mxu1 %vm369_vm3, %v1885_v11  ;;  %1548 = vmatmul.mubr.msk.bf16.vlgmr.msra.gmra.mxu0 %vm369_vm3, %v1889_v12  ;;  %v793_v26 = vshrl.u32 %v1897_v16, 16  ;;  %v796_v27 = vshll.u32 %v1897_v16, 16  ;;  %v1405_v29 = vcombine.low %v1748_v33, %v1764_v45 }
  0x2b   : > { %1536 = vmatpush3.bf16.msra.mxu1 %v1752_v37  ;;  %1537 = vmatprep.mubr.msk.bf16.mxu1 %vm369_vm3, %v1403_v54  ;;  %v1924_v10 = vsel %vm1830_vm7, %v1417_v19, %v588_v63  ;;  %v1928_v25 = vsel %vm1830_vm7, %v1418_v22, %v592_v23  ;;  %v1934_v37 = vld [vmem:[%s1706_s26 + $0x4c] sm:$0x1]  ;;  %v1404_v54 = vcombine.low %v1721_v8, %v1735_v21  ;;  %v1086_v31 = vshrl.u32 %v1940_v4, 16 }
  0x2c   : > { %1621 = vmatprep.subr.msk.bf16.mxu1 %vm382_vm0, %v1428_v17  ;;  %1566 = vmatpush3.bf16.msra.mxu0 %v826_v14  ;;  %v1948_v30 = vcombine.low %v1924_v10, %v1928_v25  ;;  %v795_v34 = vrot.slane %v793_v26, 4  ;;  %v798_v39 = vrot.slane %v796_v27, 5  ;;  %v1089_v40 = vshll.u32 %v1940_v4, 16  ;;  %v1462_v14 = vld [vmem:[%s2130_s1 + $0x1c] sm:$0xf] }
  0x2d   : > { %1551 = vmatprep.mubr.msk.bf16.mxu0 %vm369_vm3, %v1905_v18  ;;  %1624 = vmatprep.subr.msk.bf16.mxu0 %vm382_vm0, %v1456_v24  ;;  %v1095_v42 = vshll.u32 %v1934_v37, 16  ;;  %v1438_v43 = vcombine.low %v1771_v49, %v1784_v55  ;;  %v717_v44 = vsel %vm382_vm0, %v1428_v17, 0  ;;  %v1088_v46 = vrot.slane %v1086_v31, 4 }
  0x2e   : > { %v1091_v56 = vrot.slane %v1089_v40, 5  ;;  %v799_v13 = vor.u32 %v798_v39, %v795_v34  ;;  %v802_v32 = vshll.u32 %v236_v7, 16  ;;  %v1439_v60 = vcombine.low %v1806_v20, %v1818_v36  ;;  %v1469_v20 = vld [vmem:[%s2130_s1 + $0x20] sm:$0xf] }
  0x2f   : > { %v1964_v55 = vrot.slane %v1095_v42, 5  ;;  %v1406_v61 = vcombine.low %v1778_v52, %v1794_v0  ;;  %v1429_v38 = vcombine.low %v1715_v6, %v1721_v8  ;;  %v1440_v50 = vcombine.low %v1836_v53, %v1843_v41 }
  0x30   : > { %v1092_v49 = vor.u32 %v1091_v56, %v1088_v46  ;;  %v800_v51 = vrot.slane %v799_v13, 4  ;;  %v804_v62 = vrot.slane %v802_v32, 5  ;;  %v1010_v3 = vsel %vm382_vm0, %v1456_v24, 0 }
  0x31   : > { %v1430_v8 = vcombine.low %v1735_v21, %v1748_v33  ;;  %v1431_v53 = vcombine.low %v1764_v45, %v1778_v52  ;;  %v926_v41 = vsel %vm382_vm0, %v1447_v47, 0  ;;  %v1432_v21 = vcombine.low %v1794_v0, %v1897_v16 }
  0x32   : > { %1538 = vmatmul.mubr.msk.bf16.vlgmr.msra.gmra.mxu1 %vm369_vm3, %v1404_v54  ;;  %1552 = vmatmul.mubr.msk.bf16.gmra.mxu0 %vm369_vm3, %v1948_v30  ;;  %v1093_v59 = vrot.slane %v1092_v49, 4  ;;  %v805_v6 = vsel %vm1740_vm4, %v800_v51, %v804_v62  ;;  %v1448_v28 = vcombine.low %v1863_v1, %v1867_v5  ;;  %v1195_v33 = vsel %vm382_vm0, %v1469_v20, 0 }
  0x33   : > { %1556 = vmatpush3.bf16.msra.mxu1 %v717_v44  ;;  %1541 = vmatprep.mubr.msk.bf16.mxu1 %vm369_vm3, %v1405_v29  ;;  %v1441_v36 = vcombine.low %v1872_v2, %v805_v6  ;;  %v1449_v45 = vcombine.low %v1877_v9, %v1881_v57  ;;  %v1457_v52 = vcombine.low %v1897_v16, %v1940_v4  ;;  %v1446_v1 = vrot.slane %v1897_v16, 9 }
  0x34   : > { %1567 = vmatprep.mubr.msk.bf16.mxu0 %vm369_vm3, %v1438_v43  ;;  %1623 = vmatprep.subr.msk.bf16.mxu1 %vm382_vm0, %v1447_v47  ;;  %v1098_v63 = vsel %vm1740_vm4, %v1093_v59, %v1964_v55  ;;  %v1450_v0 = vcombine.low %v1894_v15, %v1924_v10  ;;  %v904_v5 = vrot.slane %v236_v7, 5  ;;  %v1107_v2 = vsel %vm382_vm0, %v1462_v14, 0 }
  0x35   : > { %v1468_v15 = vrot.slane %v1940_v4, 9  ;;  %v1185_v16 = vrot.slane %v1934_v37, 5  ;;  %v1463_v19 = vcombine.low %v805_v6, %v1098_v63 }
  0x36   : > { %v905_v9 = vsel %vm1830_vm7, %v1446_v1, %v904_v5 }
  0x37   : > { %v1451_v57 = vcombine.low %v1928_v25, %v905_v9 }
  0x3a   : > { %1542 = vmatmul.mubr.msk.bf16.gmra.mxu1 %vm369_vm3, %v1406_v61  ;;  %1568 = vmatmul.mubr.msk.bf16.vlgmr.msra.gmra.mxu0 %vm369_vm3, %v1439_v60 }
  0x3b   : > { %1557 = vmatprep.mubr.msk.bf16.mxu1 %vm369_vm3, %v1429_v38  ;;  %1586 = vmatpush3.bf16.msra.mxu0 %v1010_v3 }
  0x3c   : > { %1571 = vmatprep.mubr.msk.bf16.mxu0 %vm369_vm3, %v1440_v50  ;;  %1626 = vmatprep.subr.msk.bf16.mxu0 %vm382_vm0, %v1469_v20 }
  0x42   : > { %1558 = vmatmul.mubr.msk.bf16.vlgmr.msra.gmra.mxu1 %vm369_vm3, %v1430_v8  ;;  %1572 = vmatmul.mubr.msk.bf16.gmra.mxu0 %vm369_vm3, %v1441_v36 }
  0x43   : > { %1576 = vmatpush3.bf16.msra.mxu1 %v926_v41  ;;  %1561 = vmatprep.mubr.msk.bf16.mxu1 %vm369_vm3, %v1431_v53 }
  0x44   : > { %1587 = vmatprep.mubr.msk.bf16.mxu0 %vm369_vm3, %v1404_v54  ;;  %1625 = vmatprep.subr.msk.bf16.mxu1 %vm382_vm0, %v1462_v14 }
  0x4a   : > { %1562 = vmatmul.mubr.msk.bf16.gmra.mxu1 %vm369_vm3, %v1432_v21  ;;  %1588 = vmatmul.mubr.msk.bf16.vlgmr.msra.gmra.mxu0 %vm369_vm3, %v1405_v29 }
  0x4b   : > { %1577 = vmatprep.mubr.msk.bf16.mxu1 %vm369_vm3, %v1448_v28  ;;  %1606 = vmatpush3.bf16.msra.mxu0 %v1195_v33 }
  0x4c   : > { %1591 = vmatprep.mubr.msk.bf16.mxu0 %vm369_vm3, %v1406_v61 }
  0x52   : > { %1578 = vmatmul.mubr.msk.bf16.vlgmr.msra.gmra.mxu1 %vm369_vm3, %v1449_v45  ;;  %1592 = vmatmul.mubr.msk.bf16.gmra.mxu0 %vm369_vm3, %v1457_v52 }
  0x53   : > { %1596 = vmatpush3.bf16.msra.mxu1 %v1107_v2  ;;  %1581 = vmatprep.mubr.msk.bf16.mxu1 %vm369_vm3, %v1450_v0 }
  0x54   : > { %1607 = vmatprep.mubr.msk.bf16.mxu0 %vm369_vm3, %v1889_v12  ;;  %v1186_v12 = vsel %vm1830_vm7, %v1468_v15, %v1185_v16 }
  0x55   : > { %v1470_v17 = vcombine.low %v905_v9, %v1186_v12 }
  0x5a   : > { %1582 = vmatmul.mubr.msk.bf16.gmra.mxu1 %vm369_vm3, %v1451_v57  ;;  %1608 = vmatmul.mubr.msk.bf16.vlgmr.msra.gmra.mxu0 %vm369_vm3, %v1905_v18 }
  0x5b   : > { %1597 = vmatprep.mubr.msk.bf16.mxu1 %vm369_vm3, %v1814_v35  ;;  %1611 = vmatprep.mubr.msk.bf16.mxu0 %vm369_vm3, %v1948_v30 }
  0x62   : > { %1598 = vmatmul.mubr.msk.bf16.vlgmr.msra.gmra.mxu1 %vm369_vm3, %v1847_v58  ;;  %1612 = vmatmul.mubr.msk.bf16.gmra.mxu0 %vm369_vm3, %v1470_v17 }
  0x63   : > { %1601 = vmatprep.mubr.msk.bf16.mxu1 %vm369_vm3, %v1885_v11 }
  0x6a   : > { %1602 = vmatmul.mubr.msk.bf16.gmra.mxu1 %vm369_vm3, %v1463_v19 }
  0xe2   : > { %v1529_v18 = vpop.f32.mrf.mxu0 }
  0xe4   : > { %v420_v35 = vpop.f32.mrf.mxu0 }
  0xe6   : > { %v1530_v22 = vpop.f32.mrf.mxu0 }
  0xe8   : > { %v423_v23 = vpop.f32.mrf.mxu0 }
  0xea   : > { %v1533_v24 = vpop.f32.mrf.mxu1  ;;  %v1549_v10 = vpop.f32.mrf.mxu0 }
  0xec   : > { %v436_v48 = vpop.f32.mrf.mxu1  ;;  %v657_v25 = vpop.f32.mrf.mxu0 }
  0xee   : > { %v1534_v26 = vpop.f32.mrf.mxu1  ;;  %v1550_v27 = vpop.f32.mrf.mxu0 }
  0xf0   : > { %v2046_v37 = vpop.f32.mrf.mxu1  ;;  %v660_v58 = vpop.f32.mrf.mxu0 }
  0xf2   : > { %v1539_v4 = vpop.f32.mrf.mxu1  ;;  %v1553_v54 = vpop.f32.mrf.mxu0 }
  0xf3   : > { %v529_v36 = vadd.f32 %v1539_v4, %v1529_v18 }
  0xf4   : > { %v520_v29 = vpop.f32.mrf.mxu1  ;;  %v673_v11 = vpop.f32.mrf.mxu0 }
  0xf5   : > { %v521_v14 = vadd.f32 %v520_v29, %v420_v35  ;;  %v690_v33 = vadd.f32 %v1549_v10, %v529_v36 }
  0xf6   : > { %v1540_v30 = vpop.f32.mrf.mxu1  ;;  %v2048_v31 = vpop.f32.mrf.mxu0 }
  0xf7   : > { %v532_v45 = vadd.f32 %v1540_v30, %v1530_v22  ;;  %v688_v1 = vadd.f32 %v657_v25, %v521_v14 }
  0xf8   : > { %v523_v34 = vpop.f32.mrf.mxu1  ;;  %v2050_v39 = vpop.f32.mrf.mxu0 }
  0xf9   : > { %v524_v5 = vadd.f32 %v523_v34, %v423_v23  ;;  %v691_v15 = vadd.f32 %v1550_v27, %v532_v45  ;;  %v1287_v45 = vld [vmem:[%s2079_s18 + $0x10] sm:$0xff] }
  0xfa   : > { %v1543_v40 = vpop.f32.mrf.mxu1  ;;  %v1569_v42 = vpop.f32.mrf.mxu0 }
  0xfb   : > { %v545_v12 = vadd.f32 %v1543_v40, %v1533_v24  ;;  %v689_v35 = vadd.f32 %v660_v58, %v524_v5 }
  0xfc   : > { %v536_v43 = vpop.f32.mrf.mxu1  ;;  %v862_v44 = vpop.f32.mrf.mxu0 }
  0xfd   : > { %v537_v17 = vadd.f32 %v536_v43, %v436_v48  ;;  %v694_v34 = vadd.f32 %v1553_v54, %v545_v12 }
  0xfe   : > { %v1544_v7 = vpop.f32.mrf.mxu1  ;;  %v1570_v46 = vpop.f32.mrf.mxu0 }
  0xff   : > { %v548_v10 = vadd.f32 %v1544_v7, %v1534_v26 }
 0x100   : > { %v539_v47 = vpop.f32.mrf.mxu1  ;;  %v865_v56 = vpop.f32.mrf.mxu0 }
 0x101   : > { %v540_v14 = vadd.f32 %v539_v47, %v2046_v37  ;;  %v695_v58 = vadd.f32 %v2048_v31, %v548_v10 }
 0x102   : > { %v1559_v13 = vpop.f32.mrf.mxu1  ;;  %v2052_v32 = vpop.f32.mrf.mxu0 }
 0x103   : > { %v786_v2 = vadd.f32 %v1559_v13, %v690_v33  ;;  %v692_v13 = vadd.f32 %v673_v11, %v537_v17 }
 0x104   : > { %v753_v49 = vpop.f32.mrf.mxu1  ;;  %v2054_v55 = vpop.f32.mrf.mxu0 }
 0x105   : > { %v784_v16 = vadd.f32 %v753_v49, %v688_v1  ;;  %v895_v4 = vadd.f32 %v1569_v42, %v786_v2 }
 0x106   : > { %v1560_v59 = vpop.f32.mrf.mxu1  ;;  %v2056_v60 = vpop.f32.mrf.mxu0 }
 0x107   : > { %v787_v29 = vadd.f32 %v1560_v59, %v691_v15  ;;  %v893_v36 = vadd.f32 %v862_v44, %v784_v16  ;;  %v693_v59 = vadd.f32 %v2050_v39, %v540_v14  ;;  %v2086_v39 = vld [vmem:[%s2131_s2] ss:$0 sm:$0xff] }
 0x108   : > { %v756_v61 = vpop.f32.mrf.mxu1  ;;  %v2058_v38 = vpop.f32.mrf.mxu0 }
 0x109   : > { %v785_v25 = vadd.f32 %v756_v61, %v689_v35  ;;  %v896_v24 = vadd.f32 %v1570_v46, %v787_v29 }
 0x10a   : > { %v1563_v51 = vpop.f32.mrf.mxu1  ;;  %v1589_v62 = vpop.f32.mrf.mxu0 }
 0x10b   : > { %v790_v40 = vadd.f32 %v1563_v51, %v694_v34  ;;  %v894_v43 = vadd.f32 %v865_v56, %v785_v25 }
 0x10c   : > { %v769_v63 = vpop.f32.mrf.mxu1  ;;  %v1046_v50 = vpop.f32.mrf.mxu0 }
 0x10d   : > { %v788_v42 = vadd.f32 %v769_v63, %v692_v13  ;;  %v899_v31 = vadd.f32 %v2052_v32, %v790_v40  ;;  %v1291_v40 = vld [vmem:[%s2079_s18 + $0x30] sm:$0xff] }
 0x10e   : > { %v1564_v3 = vpop.f32.mrf.mxu1  ;;  %v1590_v20 = vpop.f32.mrf.mxu0 }
 0x10f   : > { %v791_v54 = vadd.f32 %v1564_v3, %v695_v58  ;;  %v897_v46 = vadd.f32 %v2054_v55, %v788_v42 }
 0x110   : > { %v772_v6 = vpop.f32.mrf.mxu1  ;;  %v2060_v8 = vpop.f32.mrf.mxu0 }
 0x111   : > { %v789_v56 = vadd.f32 %v772_v6, %v693_v59  ;;  %v900_v3 = vadd.f32 %v2056_v60, %v791_v54 }
 0x112   : > { %v1579_v53 = vpop.f32.mrf.mxu1  ;;  %v2062_v41 = vpop.f32.mrf.mxu0 }
 0x113   : > { %v995_v23 = vadd.f32 %v1579_v53, %v895_v4  ;;  %v898_v2 = vadd.f32 %v2058_v38, %v789_v56  ;;  %v1288_v38 = vld [vmem:[%s2079_s18 + $0x18] sm:$0xff] }
 0x114   : > { %v962_v21 = vpop.f32.mrf.mxu1  ;;  %v2064_v28 = vpop.f32.mrf.mxu0 }
 0x115   : > { %v993_v48 = vadd.f32 %v962_v21, %v893_v36  ;;  %v1079_v7 = vadd.f32 %v1589_v62, %v995_v23 }
 0x116   : > { %v1580_v52 = vpop.f32.mrf.mxu1  ;;  %v2066_v0 = vpop.f32.mrf.mxu0 }
 0x117   : > { %v996_v44 = vadd.f32 %v1580_v52, %v896_v24  ;;  %v1077_v37 = vadd.f32 %v1046_v50, %v993_v48 }
 0x118   : > { %v965_v9 = vpop.f32.mrf.mxu1  ;;  %v2068_v57 = vpop.f32.mrf.mxu0 }
 0x119   : > { %v994_v47 = vadd.f32 %v965_v9, %v894_v43  ;;  %v1080_v62 = vadd.f32 %v1590_v20, %v996_v44  ;;  %v1285_v9 = vld [vmem:[%s2079_s18] sm:$0xff] }
 0x11a   : > { %v1583_v19 = vpop.f32.mrf.mxu1  ;;  %v1609_v18 = vpop.f32.mrf.mxu0 }
 0x11b   : > { %v999_v21 = vadd.f32 %v1583_v19, %v899_v31  ;;  %v1078_v55 = vadd.f32 %v2060_v8, %v994_v47 }
 0x11c   : > { %v978_v22 = vpop.f32.mrf.mxu1  ;;  %v1231_v30 = vpop.f32.mrf.mxu0 }
 0x11d   : > { %v997_v33 = vadd.f32 %v978_v22, %v897_v46  ;;  %v1083_v19 = vadd.f32 %v2062_v41, %v999_v21 }
 0x11e   : > { %v1584_v27 = vpop.f32.mrf.mxu1  ;;  %v1610_v49 = vpop.f32.mrf.mxu0 }
 0x11f   : > { %v1000_v20 = vadd.f32 %v1584_v27, %v900_v3  ;;  %v1081_v8 = vadd.f32 %v2064_v28, %v997_v33  ;;  %v1286_v28 = vld [vmem:[%s2079_s18 + $0x8] sm:$0xff] }
 0x120   : > { %v981_v26 = vpop.f32.mrf.mxu1  ;;  %v1234_v61 = vpop.f32.mrf.mxu0 }
 0x121   : > { %v1084_v41 = vadd.f32 %v2066_v0, %v1000_v20 }
 0x122   : > { %v1599_v11 = vpop.f32.mrf.mxu1  ;;  %v1613_v32 = vpop.f32.mrf.mxu0 }
 0x123   : > { %v1176_v53 = vadd.f32 %v1599_v11, %v1079_v7  ;;  %v1289_v7 = vld [vmem:[%s2079_s18 + $0x20] sm:$0xff] }
 0x124   : > { %v1143_v51 = vpop.f32.mrf.mxu1  ;;  %v1247_v4 = vpop.f32.mrf.mxu0 }
 0x125   : > { %v1264_v63 = vadd.f32 %v1609_v18, %v1176_v53  ;;  %v1174_v50 = vadd.f32 %v1143_v51, %v1077_v37  ;;  %v998_v18 = vadd.f32 %v981_v26, %v898_v2  ;;  %v1292_v37 = vld [vmem:[%s2079_s18 + $0x38] sm:$0xff]  ;;  %v1290_v51 = vld [vmem:[%s2079_s18 + $0x28] sm:$0xff] }
 0x126   : > { %v1600_v52 = vpop.f32.mrf.mxu1  ;;  %v1614_v48 = vpop.f32.mrf.mxu0 }
 0x127   : > { %v1279_v6 = vadd.f32 %v2086_v39, %v1264_v63  ;;  %v1262_v1 = vadd.f32 %v1231_v30, %v1174_v50  ;;  %v1177_v5 = vadd.f32 %v1600_v52, %v1080_v62  ;;  %v1082_v27 = vadd.f32 %v2068_v57, %v998_v18 }
 0x128   : > { %v1146_v15 = vpop.f32.mrf.mxu1  ;;  %v1250_v47 = vpop.f32.mrf.mxu0 }
 0x129   : > { %v1295_v16 = vadd.f32 %v1287_v45, %v1279_v6  ;;  %v1277_v60 = vadd.f32 %v2086_v39, %v1262_v1  ;;  %v1265_v12 = vadd.f32 %v1610_v49, %v1177_v5  ;;  %v1175_v17 = vadd.f32 %v1146_v15, %v1078_v55 }
 0x12a   : > { %v1603_v35 = vpop.f32.mrf.mxu1 }
 0x12b   : > { %v1303_v29 = vmax.f32 %v1295_v16, 0.0  ;;  %v1293_v10 = vadd.f32 %v1285_v9, %v1277_v60  ;;  %v1280_v22 = vadd.f32 %v2086_v39, %v1265_v12  ;;  %v1263_v30 = vadd.f32 %v1234_v61, %v1175_v17 }
 0x12c   : > { %v1180_v36 = vadd.f32 %v1603_v35, %v1083_v19  ;;  %v1159_v25 = vpop.f32.mrf.mxu1 }
 0x12d   : > { %1311 = vst [vmem:[%s2102_s23 + $0x10] sm:$0xff] %v1303_v29  ;;  %v1301_v23 = vmax.f32 %v1293_v10, 0.0  ;;  %v1296_v34 = vadd.f32 %v1288_v38, %v1280_v22  ;;  %v1278_v13 = vadd.f32 %v2086_v39, %v1263_v30  ;;  %v1178_v14 = vadd.f32 %v1159_v25, %v1081_v8 }
 0x12e   : > { %v1268_v49 = vadd.f32 %v1613_v32, %v1180_v36  ;;  %v1604_v24 = vpop.f32.mrf.mxu1 }
 0x12f   : > { %1309 = vst [vmem:[%s2102_s23] sm:$0xff] %v1301_v23  ;;  %v1304_v0 = vmax.f32 %v1296_v34, 0.0  ;;  %v1294_v58 = vadd.f32 %v1286_v28, %v1278_v13  ;;  %v1266_v42 = vadd.f32 %v1247_v4, %v1178_v14  ;;  %v1181_v26 = vadd.f32 %v1604_v24, %v1084_v41 }
 0x130   : > { %v1283_v43 = vadd.f32 %v2086_v39, %v1268_v49  ;;  %v1162_v44 = vpop.f32.mrf.mxu1 }
 0x131   : > { %1312 = vst [vmem:[%s2102_s23 + $0x18] sm:$0xff] %v1304_v0  ;;  %v1302_v59 = vmax.f32 %v1294_v58, 0.0  ;;  %v1281_v57 = vadd.f32 %v2086_v39, %v1266_v42  ;;  %v1269_v54 = vadd.f32 %v1614_v48, %v1181_v26  ;;  %v1179_v11 = vadd.f32 %v1162_v44, %v1082_v27 }
 0x132   : > { %v1299_v61 = vadd.f32 %v1291_v40, %v1283_v43 }
 0x133   : > { %1310 = vst [vmem:[%s2102_s23 + $0x8] sm:$0xff] %v1302_v59  ;;  %v1297_v53 = vadd.f32 %v1289_v7, %v1281_v57  ;;  %v1284_v31 = vadd.f32 %v2086_v39, %v1269_v54  ;;  %v1267_v46 = vadd.f32 %v1250_v47, %v1179_v11 }
 0x134   : > { %v1307_v56 = vmax.f32 %v1299_v61, 0.0 }
 0x135   : > { %v1305_v62 = vmax.f32 %v1297_v53, 0.0  ;;  %v1300_v63 = vadd.f32 %v1292_v37, %v1284_v31  ;;  %v1282_v50 = vadd.f32 %v2086_v39, %v1267_v46 }
 0x136   : > { %1315 = vst [vmem:[%s2102_s23 + $0x30] sm:$0xff] %v1307_v56 }
 0x137   : > { %1313 = vst [vmem:[%s2102_s23 + $0x20] sm:$0xff] %v1305_v62  ;;  %v1308_v3 = vmax.f32 %v1300_v63, 0.0  ;;  %v1298_v21 = vadd.f32 %v1290_v51, %v1282_v50 }
 0x139   : > { %1316 = vst [vmem:[%s2102_s23 + $0x38] sm:$0xff] %v1308_v3  ;;  %v1306_v33 = vmax.f32 %v1298_v21, 0.0 }
 0x13b   : > { %1314 = vst [vmem:[%s2102_s23 + $0x28] sm:$0xff] %v1306_v33 }
 0x13c PF: > { %s14_s15 = sadd.s32 1, %s1651_s15  }
 0x13d   : > { %p11_p4 = scmp.ge.s32.totalorder %s14_s15, 4  }
 0x13f   :  { %13 = sbr.rel (!%p11_p4) target bundleno = 1 (0x1), region = 77 }

</bundles_post_ra>
